<compile_context>
chip_gen: v5e
topology: v5e:2x2
jax: 0.10.0
libtpu: 0.0.40
codegen_flags: <defaults>
</compile_context>

<pallas_src>
import math
import jax
import jax.numpy as jnp
from jax.experimental import pallas as pl
from jax.experimental.pallas import tpu as pltpu

# ---- problem sizes (small, consistent with the module) ----
B, S, D = 2, 8, 32          # batch, seq, d_model
H = 4                       # num heads
HD = D // H                 # head dim
FF = 64                     # dim_feedforward
L = 2                       # num_layers
EPS = 1e-5
SCALE = 1.0 / math.sqrt(HD)
BS = B * S                  # batch-folded row count
NEG = -1e9                  # additive mask for cross-batch attention


# ---------- math helpers (pure jnp/lax, usable inside the kernel) ----------
def _dot(a, b):
    # a: (m, k), b: (k, n)  ->  (m, n); weights are pre-transposed to (in, out).
    return jax.lax.dot_general(
        a, b, (((1,), (0,)), ((), ())), preferred_element_type=jnp.float32)


def _dot_t(a, b):
    # a: (m, k), b: (n, k)  ->  a @ b.T : (m, n)   (q @ k.T)
    return jax.lax.dot_general(
        a, b, (((1,), (1,)), ((), ())), preferred_element_type=jnp.float32)


def _layernorm(x, g, b):
    # one-pass form: two independent lane reductions (E[x], E[x^2])
    m = jnp.mean(x, axis=-1, keepdims=True)
    m2 = jnp.mean(x * x, axis=-1, keepdims=True)
    var = m2 - m * m
    return (x - m) * jax.lax.rsqrt(var + EPS) * g + b


def _encoder_layer(h, mask, wq, bq, wk, bk, wv, bv, wo, bo,
                   g1, b1n, w1t, bb1, w2t, bb2, g2, b2n):
    """One post-norm encoder layer on the batch-folded activation h: (B*S, D).

    wq/wk/wv: (H, D, HD)  per-head projections (scale folded into wq/bq)
    wo:       (H, HD, D)  per-head row-blocks of the output projection
    """
    scores = []
    vals = []
    for hh in range(H):                                    # H = 4, static
        qh = _dot(h, wq[hh]) + bq[hh]                       # (BS, HD)
        kh = _dot(h, wk[hh]) + bk[hh]                       # (BS, HD)
        vh = _dot(h, wv[hh]) + bv[hh]                       # (BS, HD)
        scores.append(_dot_t(qh, kh) + mask)                # (BS, BS)
        vals.append(vh)

    # Single softmax for all heads: sublane-stack the score matrices.
    s_all = jnp.concatenate(scores, axis=0)                 # (H*BS, BS)
    s_all = s_all - jnp.max(s_all, axis=-1, keepdims=True)
    p_all = jnp.exp(s_all)
    inv = pl.reciprocal(jnp.sum(p_all, axis=-1, keepdims=True), approx=True)
    p_all = p_all * inv

    # Per-head context, output projection folded in (no lane-dim concat).
    attn = jnp.zeros((BS, D), jnp.float32)
    for hh in range(H):
        p_h = p_all[hh * BS:(hh + 1) * BS, :]               # sublane slice
        ctx_h = _dot(p_h, vals[hh])                         # (BS, HD)
        attn = attn + _dot(ctx_h, wo[hh])                   # (BS, D)
    attn = attn + bo

    h1 = _layernorm(h + attn, g1, b1n)
    ff = _dot(jnp.maximum(_dot(h1, w1t) + bb1, 0.0), w2t) + bb2
    return _layernorm(h1 + ff, g2, b2n)


# ---------- Pallas kernel: single invocation, full layer stack ----------
def _encoder_stack_kernel(x_ref, mask_ref,
                          wq_ref, bq_ref, wk_ref, bk_ref, wv_ref, bv_ref,
                          wo_ref, bo_ref, ln1g_ref, ln1b_ref,
                          w1_ref, b1_ref, w2_ref, b2_ref,
                          ln2g_ref, ln2b_ref, out_ref):
    h = x_ref[...].astype(jnp.float32)                      # (B*S, D)
    mask = mask_ref[...]                                    # (B*S, B*S)
    for l in range(L):                                      # static unroll
        h = _encoder_layer(
            h, mask,
            wq_ref[l], bq_ref[l], wk_ref[l], bk_ref[l], wv_ref[l], bv_ref[l],
            wo_ref[l], bo_ref[l], ln1g_ref[l], ln1b_ref[l],
            w1_ref[l], b1_ref[l], w2_ref[l], b2_ref[l],
            ln2g_ref[l], ln2b_ref[l])
    out_ref[...] = h.astype(out_ref.dtype)                  # single final store


# ---------- wrapper: param re-layout (all free at trace time) ----------
def _prep_params(params):
    wqkv = params["wqkv"]                     # (L, 3D, D)  PyTorch (out, in)
    bqkv = params["bqkv"][:, 0, :]            # (L, 3D)

    def w_heads(w):                           # (L, D_out, D_in) -> (L, H, D_in, HD)
        wt = jnp.transpose(w, (0, 2, 1))      # (L, in, out)
        return jnp.transpose(wt.reshape(L, D, H, HD), (0, 2, 1, 3))

    def b_heads(b):                           # (L, D) -> (L, H, 1, HD)
        return b.reshape(L, H, HD)[:, :, None, :]

    wq = w_heads(wqkv[:, :D, :]) * SCALE      # softmax scale folded into Q
    wk = w_heads(wqkv[:, D:2 * D, :])
    wv = w_heads(wqkv[:, 2 * D:, :])
    bq = b_heads(bqkv[:, :D]) * SCALE
    bk = b_heads(bqkv[:, D:2 * D])
    bv = b_heads(bqkv[:, 2 * D:])

    # output projection: attn = ctx @ wo.T ; pre-slice wo.T per head row-block
    woT = jnp.transpose(params["wo"], (0, 2, 1))            # (L, ctx_in, out)
    wo = woT.reshape(L, H, HD, D)                           # (L, H, HD, D)

    w1t = jnp.transpose(params["w1"], (0, 2, 1))            # (L, D, FF)
    w2t = jnp.transpose(params["w2"], (0, 2, 1))            # (L, FF, D)

    return (wq, bq, wk, bk, wv, bv, wo, params["bo"],
            params["ln1g"], params["ln1b"], w1t, params["b1"],
            w2t, params["b2"], params["ln2g"], params["ln2b"])


def transformer_encoder_pallas(x, params):
    x2 = x.reshape(BS, D)                     # fold batch into matmul M dim
    # block-diagonal additive mask: kill cross-batch attention
    idx = jnp.arange(BS) // S
    mask = jnp.where(idx[:, None] == idx[None, :], 0.0, NEG).astype(jnp.float32)

    prepped = _prep_params(params)
    vmem_spec = pl.BlockSpec(memory_space=pltpu.MemorySpace.VMEM)

    out = pl.pallas_call(
        _encoder_stack_kernel,
        out_shape=jax.ShapeDtypeStruct((BS, D), x.dtype),
        in_specs=[vmem_spec] * (2 + len(prepped)),
        out_specs=vmem_spec,
    )(x2, mask, *prepped)
    return out.reshape(B, S, D)               # free XLA metadata reshape


# ---------- independent pure-JAX reference (einsum formulation) ----------
def _layernorm_ref(x, g, b):
    mu = jnp.mean(x, axis=-1, keepdims=True)
    var = jnp.mean((x - mu) ** 2, axis=-1, keepdims=True)
    return (x - mu) / jnp.sqrt(var + EPS) * g + b


def transformer_encoder_ref(x, params):
    hp = jax.lax.Precision.HIGHEST
    h = x.astype(jnp.float32)                 # (B, S, D)
    for l in range(L):
        wqkv = params["wqkv"][l]; bqkv = params["bqkv"][l][0]
        wo = params["wo"][l];     bo = params["bo"][l][0]
        g1 = params["ln1g"][l][0]; b1n = params["ln1b"][l][0]
        w1 = params["w1"][l];     bb1 = params["b1"][l][0]
        w2 = params["w2"][l];     bb2 = params["b2"][l][0]
        g2 = params["ln2g"][l][0]; b2n = params["ln2b"][l][0]

        qkv = jnp.einsum("bse,fe->bsf", h, wqkv, precision=hp) + bqkv
        q = qkv[..., :D].reshape(B, S, H, HD)
        k = qkv[..., D:2 * D].reshape(B, S, H, HD)
        v = qkv[..., 2 * D:].reshape(B, S, H, HD)
        s = jnp.einsum("bihd,bjhd->bhij", q, k, precision=hp) * SCALE
        p = jax.nn.softmax(s, axis=-1)
        ctx = jnp.einsum("bhij,bjhd->bihd", p, v, precision=hp).reshape(B, S, D)
        attn = jnp.einsum("bsd,od->bso", ctx, wo, precision=hp) + bo
        h1 = _layernorm_ref(h + attn, g1, b1n)
        z = jnp.maximum(jnp.einsum("bsd,fd->bsf", h1, w1, precision=hp) + bb1, 0.0)
        ff = jnp.einsum("bsf,of->bso", z, w2, precision=hp) + bb2
        h = _layernorm_ref(h1 + ff, g2, b2n)
    return h


def make_params(key):
    ks = jax.random.split(key, 8)
    scale = 0.02
    return {
        # MultiheadAttention: in_proj_weight (3D, D), out_proj (D, D)
        "wqkv": jax.random.normal(ks[0], (L, 3 * D, D), jnp.float32) * scale,
        "bqkv": jax.random.normal(ks[1], (L, 1, 3 * D), jnp.float32) * scale,
        "wo":   jax.random.normal(ks[2], (L, D, D), jnp.float32) * scale,
        "bo":   jax.random.normal(ks[3], (L, 1, D), jnp.float32) * scale,
        # LayerNorms
        "ln1g": jnp.ones((L, 1, D), jnp.float32),
        "ln1b": jnp.zeros((L, 1, D), jnp.float32),
        "ln2g": jnp.ones((L, 1, D), jnp.float32),
        "ln2b": jnp.zeros((L, 1, D), jnp.float32),
        # FFN: Linear(D, FF) then Linear(FF, D)  (PyTorch weight shapes)
        "w1": jax.random.normal(ks[4], (L, FF, D), jnp.float32) * scale,
        "b1": jax.random.normal(ks[5], (L, 1, FF), jnp.float32) * scale,
        "w2": jax.random.normal(ks[6], (L, D, FF), jnp.float32) * scale,
        "b2": jax.random.normal(ks[7], (L, 1, D), jnp.float32) * scale,
    }


if __name__ == "__main__":
    key = jax.random.PRNGKey(0)
    kx, kp = jax.random.split(key)
    x = jax.random.normal(kx, (B, S, D), jnp.float32)
    params = make_params(kp)

    out = jax.block_until_ready(transformer_encoder_pallas(x, params))
    ref = jax.block_until_ready(transformer_encoder_ref(x, params))

    assert out.shape == (B, S, D)
    err = jnp.max(jnp.abs(out - ref))
    assert jnp.allclose(out, ref, atol=1e-3, rtol=1e-3), f"max abs diff {err}"

    print("KERNEL_OK")
</pallas_src>

<mosaic_0001>
module attributes {stable_mosaic.version = 11 : i64} {
  func.func @_encoder_stack_kernel(%arg0: memref<16x32xf32, #tpu.memory_space<vmem>>, %arg1: memref<16x16xf32, #tpu.memory_space<vmem>>, %arg2: memref<2x4x32x8xf32, #tpu.memory_space<vmem>>, %arg3: memref<2x4x1x8xf32, #tpu.memory_space<vmem>>, %arg4: memref<2x4x32x8xf32, #tpu.memory_space<vmem>>, %arg5: memref<2x4x1x8xf32, #tpu.memory_space<vmem>>, %arg6: memref<2x4x32x8xf32, #tpu.memory_space<vmem>>, %arg7: memref<2x4x1x8xf32, #tpu.memory_space<vmem>>, %arg8: memref<2x4x8x32xf32, #tpu.memory_space<vmem>>, %arg9: memref<2x1x32xf32, #tpu.memory_space<vmem>>, %arg10: memref<2x1x32xf32, #tpu.memory_space<vmem>>, %arg11: memref<2x1x32xf32, #tpu.memory_space<vmem>>, %arg12: memref<2x32x64xf32, #tpu.memory_space<vmem>>, %arg13: memref<2x1x64xf32, #tpu.memory_space<vmem>>, %arg14: memref<2x64x32xf32, #tpu.memory_space<vmem>>, %arg15: memref<2x1x32xf32, #tpu.memory_space<vmem>>, %arg16: memref<2x1x32xf32, #tpu.memory_space<vmem>>, %arg17: memref<2x1x32xf32, #tpu.memory_space<vmem>>, %arg18: memref<16x32xf32, #tpu.memory_space<vmem>>) attributes {dimension_semantics = [], scalar_prefetch = 0 : i64, scratch_operands = 0 : i64, tpu.core_type = #tpu.core_type<tc>} {
    %c0 = arith.constant 0 : index
    %c0_0 = arith.constant 0 : index
    %0 = vector.load %arg0[%c0, %c0_0] : memref<16x32xf32, #tpu.memory_space<vmem>>, vector<16x32xf32>
    %c0_1 = arith.constant 0 : index
    %c0_2 = arith.constant 0 : index
    %1 = vector.load %arg1[%c0_1, %c0_2] : memref<16x16xf32, #tpu.memory_space<vmem>>, vector<16x16xf32>
    %c0_3 = arith.constant 0 : index
    %c0_4 = arith.constant 0 : index
    %c0_5 = arith.constant 0 : index
    %c0_6 = arith.constant 0 : index
    %2 = vector.load %arg2[%c0_3, %c0_4, %c0_5, %c0_6] : memref<2x4x32x8xf32, #tpu.memory_space<vmem>>, vector<1x4x32x8xf32>
    %3 = vector.shape_cast %2 : vector<1x4x32x8xf32> to vector<4x32x8xf32>
    %c0_7 = arith.constant 0 : index
    %c0_8 = arith.constant 0 : index
    %c0_9 = arith.constant 0 : index
    %c0_10 = arith.constant 0 : index
    %4 = vector.load %arg3[%c0_7, %c0_8, %c0_9, %c0_10] : memref<2x4x1x8xf32, #tpu.memory_space<vmem>>, vector<1x4x1x8xf32>
    %5 = vector.shape_cast %4 : vector<1x4x1x8xf32> to vector<4x1x8xf32>
    %c0_11 = arith.constant 0 : index
    %c0_12 = arith.constant 0 : index
    %c0_13 = arith.constant 0 : index
    %c0_14 = arith.constant 0 : index
    %6 = vector.load %arg4[%c0_11, %c0_12, %c0_13, %c0_14] : memref<2x4x32x8xf32, #tpu.memory_space<vmem>>, vector<1x4x32x8xf32>
    %7 = vector.shape_cast %6 : vector<1x4x32x8xf32> to vector<4x32x8xf32>
    %c0_15 = arith.constant 0 : index
    %c0_16 = arith.constant 0 : index
    %c0_17 = arith.constant 0 : index
    %c0_18 = arith.constant 0 : index
    %8 = vector.load %arg5[%c0_15, %c0_16, %c0_17, %c0_18] : memref<2x4x1x8xf32, #tpu.memory_space<vmem>>, vector<1x4x1x8xf32>
    %9 = vector.shape_cast %8 : vector<1x4x1x8xf32> to vector<4x1x8xf32>
    %c0_19 = arith.constant 0 : index
    %c0_20 = arith.constant 0 : index
    %c0_21 = arith.constant 0 : index
    %c0_22 = arith.constant 0 : index
    %10 = vector.load %arg6[%c0_19, %c0_20, %c0_21, %c0_22] : memref<2x4x32x8xf32, #tpu.memory_space<vmem>>, vector<1x4x32x8xf32>
    %11 = vector.shape_cast %10 : vector<1x4x32x8xf32> to vector<4x32x8xf32>
    %c0_23 = arith.constant 0 : index
    %c0_24 = arith.constant 0 : index
    %c0_25 = arith.constant 0 : index
    %c0_26 = arith.constant 0 : index
    %12 = vector.load %arg7[%c0_23, %c0_24, %c0_25, %c0_26] : memref<2x4x1x8xf32, #tpu.memory_space<vmem>>, vector<1x4x1x8xf32>
    %13 = vector.shape_cast %12 : vector<1x4x1x8xf32> to vector<4x1x8xf32>
    %c0_27 = arith.constant 0 : index
    %c0_28 = arith.constant 0 : index
    %c0_29 = arith.constant 0 : index
    %c0_30 = arith.constant 0 : index
    %14 = vector.load %arg8[%c0_27, %c0_28, %c0_29, %c0_30] : memref<2x4x8x32xf32, #tpu.memory_space<vmem>>, vector<1x4x8x32xf32>
    %15 = vector.shape_cast %14 : vector<1x4x8x32xf32> to vector<4x8x32xf32>
    %c0_31 = arith.constant 0 : index
    %c0_32 = arith.constant 0 : index
    %c0_33 = arith.constant 0 : index
    %16 = vector.load %arg9[%c0_31, %c0_32, %c0_33] : memref<2x1x32xf32, #tpu.memory_space<vmem>>, vector<1x1x32xf32>
    %17 = vector.shape_cast %16 : vector<1x1x32xf32> to vector<1x32xf32>
    %c0_34 = arith.constant 0 : index
    %c0_35 = arith.constant 0 : index
    %c0_36 = arith.constant 0 : index
    %18 = vector.load %arg10[%c0_34, %c0_35, %c0_36] : memref<2x1x32xf32, #tpu.memory_space<vmem>>, vector<1x1x32xf32>
    %19 = vector.shape_cast %18 : vector<1x1x32xf32> to vector<1x32xf32>
    %c0_37 = arith.constant 0 : index
    %c0_38 = arith.constant 0 : index
    %c0_39 = arith.constant 0 : index
    %20 = vector.load %arg11[%c0_37, %c0_38, %c0_39] : memref<2x1x32xf32, #tpu.memory_space<vmem>>, vector<1x1x32xf32>
    %21 = vector.shape_cast %20 : vector<1x1x32xf32> to vector<1x32xf32>
    %c0_40 = arith.constant 0 : index
    %c0_41 = arith.constant 0 : index
    %c0_42 = arith.constant 0 : index
    %22 = vector.load %arg12[%c0_40, %c0_41, %c0_42] : memref<2x32x64xf32, #tpu.memory_space<vmem>>, vector<1x32x64xf32>
    %23 = vector.shape_cast %22 : vector<1x32x64xf32> to vector<32x64xf32>
    %c0_43 = arith.constant 0 : index
    %c0_44 = arith.constant 0 : index
    %c0_45 = arith.constant 0 : index
    %24 = vector.load %arg13[%c0_43, %c0_44, %c0_45] : memref<2x1x64xf32, #tpu.memory_space<vmem>>, vector<1x1x64xf32>
    %25 = vector.shape_cast %24 : vector<1x1x64xf32> to vector<1x64xf32>
    %c0_46 = arith.constant 0 : index
    %c0_47 = arith.constant 0 : index
    %c0_48 = arith.constant 0 : index
    %26 = vector.load %arg14[%c0_46, %c0_47, %c0_48] : memref<2x64x32xf32, #tpu.memory_space<vmem>>, vector<1x64x32xf32>
    %27 = vector.shape_cast %26 : vector<1x64x32xf32> to vector<64x32xf32>
    %c0_49 = arith.constant 0 : index
    %c0_50 = arith.constant 0 : index
    %c0_51 = arith.constant 0 : index
    %28 = vector.load %arg15[%c0_49, %c0_50, %c0_51] : memref<2x1x32xf32, #tpu.memory_space<vmem>>, vector<1x1x32xf32>
    %29 = vector.shape_cast %28 : vector<1x1x32xf32> to vector<1x32xf32>
    %c0_52 = arith.constant 0 : index
    %c0_53 = arith.constant 0 : index
    %c0_54 = arith.constant 0 : index
    %30 = vector.load %arg16[%c0_52, %c0_53, %c0_54] : memref<2x1x32xf32, #tpu.memory_space<vmem>>, vector<1x1x32xf32>
    %31 = vector.shape_cast %30 : vector<1x1x32xf32> to vector<1x32xf32>
    %c0_55 = arith.constant 0 : index
    %c0_56 = arith.constant 0 : index
    %c0_57 = arith.constant 0 : index
    %32 = vector.load %arg17[%c0_55, %c0_56, %c0_57] : memref<2x1x32xf32, #tpu.memory_space<vmem>>, vector<1x1x32xf32>
    %33 = vector.shape_cast %32 : vector<1x1x32xf32> to vector<1x32xf32>
    %34 = vector.extract_strided_slice %3 {offsets = [0, 0, 0], sizes = [1, 32, 8], strides = [1, 1, 1]} : vector<4x32x8xf32> to vector<1x32x8xf32>
    %35 = vector.shape_cast %34 : vector<1x32x8xf32> to vector<32x8xf32>
    %cst = arith.constant dense<0.000000e+00> : vector<16x8xf32>
    %36 = tpu.matmul %0, %35, %cst {dimension_numbers = #tpu.dot_dimension_numbers<[1], [0], [0], [1], [0, 0, 1, 1], [], []>} : vector<16x32xf32>, vector<32x8xf32>, vector<16x8xf32> -> vector<16x8xf32>
    %37 = vector.extract_strided_slice %5 {offsets = [0, 0, 0], sizes = [1, 1, 8], strides = [1, 1, 1]} : vector<4x1x8xf32> to vector<1x1x8xf32>
    %38 = vector.shape_cast %37 : vector<1x1x8xf32> to vector<1x8xf32>
    %39 = vector.broadcast %38 : vector<1x8xf32> to vector<16x8xf32>
    %40 = arith.addf %36, %39 : vector<16x8xf32>
    %41 = vector.extract_strided_slice %7 {offsets = [0, 0, 0], sizes = [1, 32, 8], strides = [1, 1, 1]} : vector<4x32x8xf32> to vector<1x32x8xf32>
    %42 = vector.shape_cast %41 : vector<1x32x8xf32> to vector<32x8xf32>
    %cst_58 = arith.constant dense<0.000000e+00> : vector<16x8xf32>
    %43 = tpu.matmul %0, %42, %cst_58 {dimension_numbers = #tpu.dot_dimension_numbers<[1], [0], [0], [1], [0, 0, 1, 1], [], []>} : vector<16x32xf32>, vector<32x8xf32>, vector<16x8xf32> -> vector<16x8xf32>
    %44 = vector.extract_strided_slice %9 {offsets = [0, 0, 0], sizes = [1, 1, 8], strides = [1, 1, 1]} : vector<4x1x8xf32> to vector<1x1x8xf32>
    %45 = vector.shape_cast %44 : vector<1x1x8xf32> to vector<1x8xf32>
    %46 = vector.broadcast %45 : vector<1x8xf32> to vector<16x8xf32>
    %47 = arith.addf %43, %46 : vector<16x8xf32>
    %48 = vector.extract_strided_slice %11 {offsets = [0, 0, 0], sizes = [1, 32, 8], strides = [1, 1, 1]} : vector<4x32x8xf32> to vector<1x32x8xf32>
    %49 = vector.shape_cast %48 : vector<1x32x8xf32> to vector<32x8xf32>
    %cst_59 = arith.constant dense<0.000000e+00> : vector<16x8xf32>
    %50 = tpu.matmul %0, %49, %cst_59 {dimension_numbers = #tpu.dot_dimension_numbers<[1], [0], [0], [1], [0, 0, 1, 1], [], []>} : vector<16x32xf32>, vector<32x8xf32>, vector<16x8xf32> -> vector<16x8xf32>
    %51 = vector.extract_strided_slice %13 {offsets = [0, 0, 0], sizes = [1, 1, 8], strides = [1, 1, 1]} : vector<4x1x8xf32> to vector<1x1x8xf32>
    %52 = vector.shape_cast %51 : vector<1x1x8xf32> to vector<1x8xf32>
    %53 = vector.broadcast %52 : vector<1x8xf32> to vector<16x8xf32>
    %54 = arith.addf %50, %53 : vector<16x8xf32>
    %cst_60 = arith.constant dense<0.000000e+00> : vector<16x16xf32>
    %55 = tpu.matmul %40, %47, %cst_60 {dimension_numbers = #tpu.dot_dimension_numbers<[1], [1], [0], [0], [0, 0, 1, 0], [], []>} : vector<16x8xf32>, vector<16x8xf32>, vector<16x16xf32> -> vector<16x16xf32>
    %56 = arith.addf %55, %1 : vector<16x16xf32>
    %57 = vector.extract_strided_slice %3 {offsets = [1, 0, 0], sizes = [1, 32, 8], strides = [1, 1, 1]} : vector<4x32x8xf32> to vector<1x32x8xf32>
    %58 = vector.shape_cast %57 : vector<1x32x8xf32> to vector<32x8xf32>
    %cst_61 = arith.constant dense<0.000000e+00> : vector<16x8xf32>
    %59 = tpu.matmul %0, %58, %cst_61 {dimension_numbers = #tpu.dot_dimension_numbers<[1], [0], [0], [1], [0, 0, 1, 1], [], []>} : vector<16x32xf32>, vector<32x8xf32>, vector<16x8xf32> -> vector<16x8xf32>
    %60 = vector.extract_strided_slice %5 {offsets = [1, 0, 0], sizes = [1, 1, 8], strides = [1, 1, 1]} : vector<4x1x8xf32> to vector<1x1x8xf32>
    %61 = vector.shape_cast %60 : vector<1x1x8xf32> to vector<1x8xf32>
    %62 = vector.broadcast %61 : vector<1x8xf32> to vector<16x8xf32>
    %63 = arith.addf %59, %62 : vector<16x8xf32>
    %64 = vector.extract_strided_slice %7 {offsets = [1, 0, 0], sizes = [1, 32, 8], strides = [1, 1, 1]} : vector<4x32x8xf32> to vector<1x32x8xf32>
    %65 = vector.shape_cast %64 : vector<1x32x8xf32> to vector<32x8xf32>
    %cst_62 = arith.constant dense<0.000000e+00> : vector<16x8xf32>
    %66 = tpu.matmul %0, %65, %cst_62 {dimension_numbers = #tpu.dot_dimension_numbers<[1], [0], [0], [1], [0, 0, 1, 1], [], []>} : vector<16x32xf32>, vector<32x8xf32>, vector<16x8xf32> -> vector<16x8xf32>
    %67 = vector.extract_strided_slice %9 {offsets = [1, 0, 0], sizes = [1, 1, 8], strides = [1, 1, 1]} : vector<4x1x8xf32> to vector<1x1x8xf32>
    %68 = vector.shape_cast %67 : vector<1x1x8xf32> to vector<1x8xf32>
    %69 = vector.broadcast %68 : vector<1x8xf32> to vector<16x8xf32>
    %70 = arith.addf %66, %69 : vector<16x8xf32>
    %71 = vector.extract_strided_slice %11 {offsets = [1, 0, 0], sizes = [1, 32, 8], strides = [1, 1, 1]} : vector<4x32x8xf32> to vector<1x32x8xf32>
    %72 = vector.shape_cast %71 : vector<1x32x8xf32> to vector<32x8xf32>
    %cst_63 = arith.constant dense<0.000000e+00> : vector<16x8xf32>
    %73 = tpu.matmul %0, %72, %cst_63 {dimension_numbers = #tpu.dot_dimension_numbers<[1], [0], [0], [1], [0, 0, 1, 1], [], []>} : vector<16x32xf32>, vector<32x8xf32>, vector<16x8xf32> -> vector<16x8xf32>
    %74 = vector.extract_strided_slice %13 {offsets = [1, 0, 0], sizes = [1, 1, 8], strides = [1, 1, 1]} : vector<4x1x8xf32> to vector<1x1x8xf32>
    %75 = vector.shape_cast %74 : vector<1x1x8xf32> to vector<1x8xf32>
    %76 = vector.broadcast %75 : vector<1x8xf32> to vector<16x8xf32>
    %77 = arith.addf %73, %76 : vector<16x8xf32>
    %cst_64 = arith.constant dense<0.000000e+00> : vector<16x16xf32>
    %78 = tpu.matmul %63, %70, %cst_64 {dimension_numbers = #tpu.dot_dimension_numbers<[1], [1], [0], [0], [0, 0, 1, 0], [], []>} : vector<16x8xf32>, vector<16x8xf32>, vector<16x16xf32> -> vector<16x16xf32>
    %79 = arith.addf %78, %1 : vector<16x16xf32>
    %80 = vector.extract_strided_slice %3 {offsets = [2, 0, 0], sizes = [1, 32, 8], strides = [1, 1, 1]} : vector<4x32x8xf32> to vector<1x32x8xf32>
    %81 = vector.shape_cast %80 : vector<1x32x8xf32> to vector<32x8xf32>
    %cst_65 = arith.constant dense<0.000000e+00> : vector<16x8xf32>
    %82 = tpu.matmul %0, %81, %cst_65 {dimension_numbers = #tpu.dot_dimension_numbers<[1], [0], [0], [1], [0, 0, 1, 1], [], []>} : vector<16x32xf32>, vector<32x8xf32>, vector<16x8xf32> -> vector<16x8xf32>
    %83 = vector.extract_strided_slice %5 {offsets = [2, 0, 0], sizes = [1, 1, 8], strides = [1, 1, 1]} : vector<4x1x8xf32> to vector<1x1x8xf32>
    %84 = vector.shape_cast %83 : vector<1x1x8xf32> to vector<1x8xf32>
    %85 = vector.broadcast %84 : vector<1x8xf32> to vector<16x8xf32>
    %86 = arith.addf %82, %85 : vector<16x8xf32>
    %87 = vector.extract_strided_slice %7 {offsets = [2, 0, 0], sizes = [1, 32, 8], strides = [1, 1, 1]} : vector<4x32x8xf32> to vector<1x32x8xf32>
    %88 = vector.shape_cast %87 : vector<1x32x8xf32> to vector<32x8xf32>
    %cst_66 = arith.constant dense<0.000000e+00> : vector<16x8xf32>
    %89 = tpu.matmul %0, %88, %cst_66 {dimension_numbers = #tpu.dot_dimension_numbers<[1], [0], [0], [1], [0, 0, 1, 1], [], []>} : vector<16x32xf32>, vector<32x8xf32>, vector<16x8xf32> -> vector<16x8xf32>
    %90 = vector.extract_strided_slice %9 {offsets = [2, 0, 0], sizes = [1, 1, 8], strides = [1, 1, 1]} : vector<4x1x8xf32> to vector<1x1x8xf32>
    %91 = vector.shape_cast %90 : vector<1x1x8xf32> to vector<1x8xf32>
    %92 = vector.broadcast %91 : vector<1x8xf32> to vector<16x8xf32>
    %93 = arith.addf %89, %92 : vector<16x8xf32>
    %94 = vector.extract_strided_slice %11 {offsets = [2, 0, 0], sizes = [1, 32, 8], strides = [1, 1, 1]} : vector<4x32x8xf32> to vector<1x32x8xf32>
    %95 = vector.shape_cast %94 : vector<1x32x8xf32> to vector<32x8xf32>
    %cst_67 = arith.constant dense<0.000000e+00> : vector<16x8xf32>
    %96 = tpu.matmul %0, %95, %cst_67 {dimension_numbers = #tpu.dot_dimension_numbers<[1], [0], [0], [1], [0, 0, 1, 1], [], []>} : vector<16x32xf32>, vector<32x8xf32>, vector<16x8xf32> -> vector<16x8xf32>
    %97 = vector.extract_strided_slice %13 {offsets = [2, 0, 0], sizes = [1, 1, 8], strides = [1, 1, 1]} : vector<4x1x8xf32> to vector<1x1x8xf32>
    %98 = vector.shape_cast %97 : vector<1x1x8xf32> to vector<1x8xf32>
    %99 = vector.broadcast %98 : vector<1x8xf32> to vector<16x8xf32>
    %100 = arith.addf %96, %99 : vector<16x8xf32>
    %cst_68 = arith.constant dense<0.000000e+00> : vector<16x16xf32>
    %101 = tpu.matmul %86, %93, %cst_68 {dimension_numbers = #tpu.dot_dimension_numbers<[1], [1], [0], [0], [0, 0, 1, 0], [], []>} : vector<16x8xf32>, vector<16x8xf32>, vector<16x16xf32> -> vector<16x16xf32>
    %102 = arith.addf %101, %1 : vector<16x16xf32>
    %103 = vector.extract_strided_slice %3 {offsets = [3, 0, 0], sizes = [1, 32, 8], strides = [1, 1, 1]} : vector<4x32x8xf32> to vector<1x32x8xf32>
    %104 = vector.shape_cast %103 : vector<1x32x8xf32> to vector<32x8xf32>
    %cst_69 = arith.constant dense<0.000000e+00> : vector<16x8xf32>
    %105 = tpu.matmul %0, %104, %cst_69 {dimension_numbers = #tpu.dot_dimension_numbers<[1], [0], [0], [1], [0, 0, 1, 1], [], []>} : vector<16x32xf32>, vector<32x8xf32>, vector<16x8xf32> -> vector<16x8xf32>
    %106 = vector.extract_strided_slice %5 {offsets = [3, 0, 0], sizes = [1, 1, 8], strides = [1, 1, 1]} : vector<4x1x8xf32> to vector<1x1x8xf32>
    %107 = vector.shape_cast %106 : vector<1x1x8xf32> to vector<1x8xf32>
    %108 = vector.broadcast %107 : vector<1x8xf32> to vector<16x8xf32>
    %109 = arith.addf %105, %108 : vector<16x8xf32>
    %110 = vector.extract_strided_slice %7 {offsets = [3, 0, 0], sizes = [1, 32, 8], strides = [1, 1, 1]} : vector<4x32x8xf32> to vector<1x32x8xf32>
    %111 = vector.shape_cast %110 : vector<1x32x8xf32> to vector<32x8xf32>
    %cst_70 = arith.constant dense<0.000000e+00> : vector<16x8xf32>
    %112 = tpu.matmul %0, %111, %cst_70 {dimension_numbers = #tpu.dot_dimension_numbers<[1], [0], [0], [1], [0, 0, 1, 1], [], []>} : vector<16x32xf32>, vector<32x8xf32>, vector<16x8xf32> -> vector<16x8xf32>
    %113 = vector.extract_strided_slice %9 {offsets = [3, 0, 0], sizes = [1, 1, 8], strides = [1, 1, 1]} : vector<4x1x8xf32> to vector<1x1x8xf32>
    %114 = vector.shape_cast %113 : vector<1x1x8xf32> to vector<1x8xf32>
    %115 = vector.broadcast %114 : vector<1x8xf32> to vector<16x8xf32>
    %116 = arith.addf %112, %115 : vector<16x8xf32>
    %117 = vector.extract_strided_slice %11 {offsets = [3, 0, 0], sizes = [1, 32, 8], strides = [1, 1, 1]} : vector<4x32x8xf32> to vector<1x32x8xf32>
    %118 = vector.shape_cast %117 : vector<1x32x8xf32> to vector<32x8xf32>
    %cst_71 = arith.constant dense<0.000000e+00> : vector<16x8xf32>
    %119 = tpu.matmul %0, %118, %cst_71 {dimension_numbers = #tpu.dot_dimension_numbers<[1], [0], [0], [1], [0, 0, 1, 1], [], []>} : vector<16x32xf32>, vector<32x8xf32>, vector<16x8xf32> -> vector<16x8xf32>
    %120 = vector.extract_strided_slice %13 {offsets = [3, 0, 0], sizes = [1, 1, 8], strides = [1, 1, 1]} : vector<4x1x8xf32> to vector<1x1x8xf32>
    %121 = vector.shape_cast %120 : vector<1x1x8xf32> to vector<1x8xf32>
    %122 = vector.broadcast %121 : vector<1x8xf32> to vector<16x8xf32>
    %123 = arith.addf %119, %122 : vector<16x8xf32>
    %cst_72 = arith.constant dense<0.000000e+00> : vector<16x16xf32>
    %124 = tpu.matmul %109, %116, %cst_72 {dimension_numbers = #tpu.dot_dimension_numbers<[1], [1], [0], [0], [0, 0, 1, 0], [], []>} : vector<16x8xf32>, vector<16x8xf32>, vector<16x16xf32> -> vector<16x16xf32>
    %125 = arith.addf %124, %1 : vector<16x16xf32>
    %126 = tpu.concatenate %56, %79, %102, %125 in 0 : vector<16x16xf32>, vector<16x16xf32>, vector<16x16xf32>, vector<16x16xf32> -> vector<64x16xf32>
    %cst_73 = arith.constant dense<0xFF800000> : vector<64xf32>
    %127 = vector.multi_reduction <maximumf>, %126, %cst_73 [1] : vector<64x16xf32> to vector<64xf32>
    %128 = vector.shape_cast %127 : vector<64xf32> to vector<64x1xf32>
    %129 = vector.broadcast %128 : vector<64x1xf32> to vector<64x16xf32>
    %130 = arith.subf %126, %129 : vector<64x16xf32>
    %131 = math.exp %130 : vector<64x16xf32>
    %cst_74 = arith.constant dense<0.000000e+00> : vector<64xf32>
    %132 = vector.multi_reduction <add>, %131, %cst_74 [1] : vector<64x16xf32> to vector<64xf32>
    %133 = vector.shape_cast %132 : vector<64xf32> to vector<64x1xf32>
    %134 = tpu.reciprocal %133 {approx = true} : vector<64x1xf32> -> vector<64x1xf32>
    %135 = vector.broadcast %134 : vector<64x1xf32> to vector<64x16xf32>
    %136 = arith.mulf %131, %135 : vector<64x16xf32>
    %cst_75 = arith.constant 0.000000e+00 : f32
    %137 = vector.broadcast %cst_75 : f32 to vector<16x32xf32>
    %138 = vector.extract_strided_slice %136 {offsets = [0, 0], sizes = [16, 16], strides = [1, 1]} : vector<64x16xf32> to vector<16x16xf32>
    %cst_76 = arith.constant dense<0.000000e+00> : vector<16x8xf32>
    %139 = tpu.matmul %138, %54, %cst_76 {dimension_numbers = #tpu.dot_dimension_numbers<[1], [0], [0], [1], [0, 0, 1, 1], [], []>} : vector<16x16xf32>, vector<16x8xf32>, vector<16x8xf32> -> vector<16x8xf32>
    %140 = vector.extract_strided_slice %15 {offsets = [0, 0, 0], sizes = [1, 8, 32], strides = [1, 1, 1]} : vector<4x8x32xf32> to vector<1x8x32xf32>
    %141 = vector.shape_cast %140 : vector<1x8x32xf32> to vector<8x32xf32>
    %cst_77 = arith.constant dense<0.000000e+00> : vector<16x32xf32>
    %142 = tpu.matmul %139, %141, %cst_77 {dimension_numbers = #tpu.dot_dimension_numbers<[1], [0], [0], [1], [0, 0, 1, 1], [], []>} : vector<16x8xf32>, vector<8x32xf32>, vector<16x32xf32> -> vector<16x32xf32>
    %143 = arith.addf %137, %142 : vector<16x32xf32>
    %144 = vector.extract_strided_slice %136 {offsets = [16, 0], sizes = [16, 16], strides = [1, 1]} : vector<64x16xf32> to vector<16x16xf32>
    %cst_78 = arith.constant dense<0.000000e+00> : vector<16x8xf32>
    %145 = tpu.matmul %144, %77, %cst_78 {dimension_numbers = #tpu.dot_dimension_numbers<[1], [0], [0], [1], [0, 0, 1, 1], [], []>} : vector<16x16xf32>, vector<16x8xf32>, vector<16x8xf32> -> vector<16x8xf32>
    %146 = vector.extract_strided_slice %15 {offsets = [1, 0, 0], sizes = [1, 8, 32], strides = [1, 1, 1]} : vector<4x8x32xf32> to vector<1x8x32xf32>
    %147 = vector.shape_cast %146 : vector<1x8x32xf32> to vector<8x32xf32>
    %cst_79 = arith.constant dense<0.000000e+00> : vector<16x32xf32>
    %148 = tpu.matmul %145, %147, %cst_79 {dimension_numbers = #tpu.dot_dimension_numbers<[1], [0], [0], [1], [0, 0, 1, 1], [], []>} : vector<16x8xf32>, vector<8x32xf32>, vector<16x32xf32> -> vector<16x32xf32>
    %149 = arith.addf %143, %148 : vector<16x32xf32>
    %150 = vector.extract_strided_slice %136 {offsets = [32, 0], sizes = [16, 16], strides = [1, 1]} : vector<64x16xf32> to vector<16x16xf32>
    %cst_80 = arith.constant dense<0.000000e+00> : vector<16x8xf32>
    %151 = tpu.matmul %150, %100, %cst_80 {dimension_numbers = #tpu.dot_dimension_numbers<[1], [0], [0], [1], [0, 0, 1, 1], [], []>} : vector<16x16xf32>, vector<16x8xf32>, vector<16x8xf32> -> vector<16x8xf32>
    %152 = vector.extract_strided_slice %15 {offsets = [2, 0, 0], sizes = [1, 8, 32], strides = [1, 1, 1]} : vector<4x8x32xf32> to vector<1x8x32xf32>
    %153 = vector.shape_cast %152 : vector<1x8x32xf32> to vector<8x32xf32>
    %cst_81 = arith.constant dense<0.000000e+00> : vector<16x32xf32>
    %154 = tpu.matmul %151, %153, %cst_81 {dimension_numbers = #tpu.dot_dimension_numbers<[1], [0], [0], [1], [0, 0, 1, 1], [], []>} : vector<16x8xf32>, vector<8x32xf32>, vector<16x32xf32> -> vector<16x32xf32>
    %155 = arith.addf %149, %154 : vector<16x32xf32>
    %156 = vector.extract_strided_slice %136 {offsets = [48, 0], sizes = [16, 16], strides = [1, 1]} : vector<64x16xf32> to vector<16x16xf32>
    %cst_82 = arith.constant dense<0.000000e+00> : vector<16x8xf32>
    %157 = tpu.matmul %156, %123, %cst_82 {dimension_numbers = #tpu.dot_dimension_numbers<[1], [0], [0], [1], [0, 0, 1, 1], [], []>} : vector<16x16xf32>, vector<16x8xf32>, vector<16x8xf32> -> vector<16x8xf32>
    %158 = vector.extract_strided_slice %15 {offsets = [3, 0, 0], sizes = [1, 8, 32], strides = [1, 1, 1]} : vector<4x8x32xf32> to vector<1x8x32xf32>
    %159 = vector.shape_cast %158 : vector<1x8x32xf32> to vector<8x32xf32>
    %cst_83 = arith.constant dense<0.000000e+00> : vector<16x32xf32>
    %160 = tpu.matmul %157, %159, %cst_83 {dimension_numbers = #tpu.dot_dimension_numbers<[1], [0], [0], [1], [0, 0, 1, 1], [], []>} : vector<16x8xf32>, vector<8x32xf32>, vector<16x32xf32> -> vector<16x32xf32>
    %161 = arith.addf %155, %160 : vector<16x32xf32>
    %162 = vector.broadcast %17 : vector<1x32xf32> to vector<16x32xf32>
    %163 = arith.addf %161, %162 : vector<16x32xf32>
    %164 = arith.addf %0, %163 : vector<16x32xf32>
    %cst_84 = arith.constant dense<0.000000e+00> : vector<16xf32>
    %165 = vector.multi_reduction <add>, %164, %cst_84 [1] : vector<16x32xf32> to vector<16xf32>
    %166 = vector.shape_cast %165 : vector<16xf32> to vector<16x1xf32>
    %cst_85 = arith.constant 3.200000e+01 : f32
    %167 = vector.broadcast %cst_85 : f32 to vector<16x1xf32>
    %168 = arith.divf %166, %167 : vector<16x1xf32>
    %169 = arith.mulf %164, %164 : vector<16x32xf32>
    %cst_86 = arith.constant dense<0.000000e+00> : vector<16xf32>
    %170 = vector.multi_reduction <add>, %169, %cst_86 [1] : vector<16x32xf32> to vector<16xf32>
    %171 = vector.shape_cast %170 : vector<16xf32> to vector<16x1xf32>
    %cst_87 = arith.constant 3.200000e+01 : f32
    %172 = vector.broadcast %cst_87 : f32 to vector<16x1xf32>
    %173 = arith.divf %171, %172 : vector<16x1xf32>
    %174 = arith.mulf %168, %168 : vector<16x1xf32>
    %175 = arith.subf %173, %174 : vector<16x1xf32>
    %176 = vector.broadcast %168 : vector<16x1xf32> to vector<16x32xf32>
    %177 = arith.subf %164, %176 : vector<16x32xf32>
    %cst_88 = arith.constant 9.99999974E-6 : f32
    %178 = vector.broadcast %cst_88 : f32 to vector<16x1xf32>
    %179 = arith.addf %175, %178 : vector<16x1xf32>
    %180 = math.rsqrt %179 : vector<16x1xf32>
    %181 = vector.broadcast %180 : vector<16x1xf32> to vector<16x32xf32>
    %182 = arith.mulf %177, %181 : vector<16x32xf32>
    %183 = vector.broadcast %19 : vector<1x32xf32> to vector<16x32xf32>
    %184 = arith.mulf %182, %183 : vector<16x32xf32>
    %185 = vector.broadcast %21 : vector<1x32xf32> to vector<16x32xf32>
    %186 = arith.addf %184, %185 : vector<16x32xf32>
    %cst_89 = arith.constant dense<0.000000e+00> : vector<16x64xf32>
    %187 = tpu.matmul %186, %23, %cst_89 {dimension_numbers = #tpu.dot_dimension_numbers<[1], [0], [0], [1], [0, 0, 1, 1], [], []>} : vector<16x32xf32>, vector<32x64xf32>, vector<16x64xf32> -> vector<16x64xf32>
    %188 = vector.broadcast %25 : vector<1x64xf32> to vector<16x64xf32>
    %189 = arith.addf %187, %188 : vector<16x64xf32>
    %cst_90 = arith.constant 0.000000e+00 : f32
    %190 = vector.broadcast %cst_90 : f32 to vector<16x64xf32>
    %191 = arith.maximumf %189, %190 : vector<16x64xf32>
    %cst_91 = arith.constant dense<0.000000e+00> : vector<16x32xf32>
    %192 = tpu.matmul %191, %27, %cst_91 {dimension_numbers = #tpu.dot_dimension_numbers<[1], [0], [0], [1], [0, 0, 1, 1], [], []>} : vector<16x64xf32>, vector<64x32xf32>, vector<16x32xf32> -> vector<16x32xf32>
    %193 = vector.broadcast %29 : vector<1x32xf32> to vector<16x32xf32>
    %194 = arith.addf %192, %193 : vector<16x32xf32>
    %195 = arith.addf %186, %194 : vector<16x32xf32>
    %cst_92 = arith.constant dense<0.000000e+00> : vector<16xf32>
    %196 = vector.multi_reduction <add>, %195, %cst_92 [1] : vector<16x32xf32> to vector<16xf32>
    %197 = vector.shape_cast %196 : vector<16xf32> to vector<16x1xf32>
    %cst_93 = arith.constant 3.200000e+01 : f32
    %198 = vector.broadcast %cst_93 : f32 to vector<16x1xf32>
    %199 = arith.divf %197, %198 : vector<16x1xf32>
    %200 = arith.mulf %195, %195 : vector<16x32xf32>
    %cst_94 = arith.constant dense<0.000000e+00> : vector<16xf32>
    %201 = vector.multi_reduction <add>, %200, %cst_94 [1] : vector<16x32xf32> to vector<16xf32>
    %202 = vector.shape_cast %201 : vector<16xf32> to vector<16x1xf32>
    %cst_95 = arith.constant 3.200000e+01 : f32
    %203 = vector.broadcast %cst_95 : f32 to vector<16x1xf32>
    %204 = arith.divf %202, %203 : vector<16x1xf32>
    %205 = arith.mulf %199, %199 : vector<16x1xf32>
    %206 = arith.subf %204, %205 : vector<16x1xf32>
    %207 = vector.broadcast %199 : vector<16x1xf32> to vector<16x32xf32>
    %208 = arith.subf %195, %207 : vector<16x32xf32>
    %cst_96 = arith.constant 9.99999974E-6 : f32
    %209 = vector.broadcast %cst_96 : f32 to vector<16x1xf32>
    %210 = arith.addf %206, %209 : vector<16x1xf32>
    %211 = math.rsqrt %210 : vector<16x1xf32>
    %212 = vector.broadcast %211 : vector<16x1xf32> to vector<16x32xf32>
    %213 = arith.mulf %208, %212 : vector<16x32xf32>
    %214 = vector.broadcast %31 : vector<1x32xf32> to vector<16x32xf32>
    %215 = arith.mulf %213, %214 : vector<16x32xf32>
    %216 = vector.broadcast %33 : vector<1x32xf32> to vector<16x32xf32>
    %217 = arith.addf %215, %216 : vector<16x32xf32>
    %c1 = arith.constant 1 : index
    %c0_97 = arith.constant 0 : index
    %c0_98 = arith.constant 0 : index
    %c0_99 = arith.constant 0 : index
    %218 = vector.load %arg2[%c1, %c0_97, %c0_98, %c0_99] : memref<2x4x32x8xf32, #tpu.memory_space<vmem>>, vector<1x4x32x8xf32>
    %219 = vector.shape_cast %218 : vector<1x4x32x8xf32> to vector<4x32x8xf32>
    %c1_100 = arith.constant 1 : index
    %c0_101 = arith.constant 0 : index
    %c0_102 = arith.constant 0 : index
    %c0_103 = arith.constant 0 : index
    %220 = vector.load %arg3[%c1_100, %c0_101, %c0_102, %c0_103] : memref<2x4x1x8xf32, #tpu.memory_space<vmem>>, vector<1x4x1x8xf32>
    %221 = vector.shape_cast %220 : vector<1x4x1x8xf32> to vector<4x1x8xf32>
    %c1_104 = arith.constant 1 : index
    %c0_105 = arith.constant 0 : index
    %c0_106 = arith.constant 0 : index
    %c0_107 = arith.constant 0 : index
    %222 = vector.load %arg4[%c1_104, %c0_105, %c0_106, %c0_107] : memref<2x4x32x8xf32, #tpu.memory_space<vmem>>, vector<1x4x32x8xf32>
    %223 = vector.shape_cast %222 : vector<1x4x32x8xf32> to vector<4x32x8xf32>
    %c1_108 = arith.constant 1 : index
    %c0_109 = arith.constant 0 : index
    %c0_110 = arith.constant 0 : index
    %c0_111 = arith.constant 0 : index
    %224 = vector.load %arg5[%c1_108, %c0_109, %c0_110, %c0_111] : memref<2x4x1x8xf32, #tpu.memory_space<vmem>>, vector<1x4x1x8xf32>
    %225 = vector.shape_cast %224 : vector<1x4x1x8xf32> to vector<4x1x8xf32>
    %c1_112 = arith.constant 1 : index
    %c0_113 = arith.constant 0 : index
    %c0_114 = arith.constant 0 : index
    %c0_115 = arith.constant 0 : index
    %226 = vector.load %arg6[%c1_112, %c0_113, %c0_114, %c0_115] : memref<2x4x32x8xf32, #tpu.memory_space<vmem>>, vector<1x4x32x8xf32>
    %227 = vector.shape_cast %226 : vector<1x4x32x8xf32> to vector<4x32x8xf32>
    %c1_116 = arith.constant 1 : index
    %c0_117 = arith.constant 0 : index
    %c0_118 = arith.constant 0 : index
    %c0_119 = arith.constant 0 : index
    %228 = vector.load %arg7[%c1_116, %c0_117, %c0_118, %c0_119] : memref<2x4x1x8xf32, #tpu.memory_space<vmem>>, vector<1x4x1x8xf32>
    %229 = vector.shape_cast %228 : vector<1x4x1x8xf32> to vector<4x1x8xf32>
    %c1_120 = arith.constant 1 : index
    %c0_121 = arith.constant 0 : index
    %c0_122 = arith.constant 0 : index
    %c0_123 = arith.constant 0 : index
    %230 = vector.load %arg8[%c1_120, %c0_121, %c0_122, %c0_123] : memref<2x4x8x32xf32, #tpu.memory_space<vmem>>, vector<1x4x8x32xf32>
    %231 = vector.shape_cast %230 : vector<1x4x8x32xf32> to vector<4x8x32xf32>
    %c1_124 = arith.constant 1 : index
    %c0_125 = arith.constant 0 : index
    %c0_126 = arith.constant 0 : index
    %232 = vector.load %arg9[%c1_124, %c0_125, %c0_126] : memref<2x1x32xf32, #tpu.memory_space<vmem>>, vector<1x1x32xf32>
    %233 = vector.shape_cast %232 : vector<1x1x32xf32> to vector<1x32xf32>
    %c1_127 = arith.constant 1 : index
    %c0_128 = arith.constant 0 : index
    %c0_129 = arith.constant 0 : index
    %234 = vector.load %arg10[%c1_127, %c0_128, %c0_129] : memref<2x1x32xf32, #tpu.memory_space<vmem>>, vector<1x1x32xf32>
    %235 = vector.shape_cast %234 : vector<1x1x32xf32> to vector<1x32xf32>
    %c1_130 = arith.constant 1 : index
    %c0_131 = arith.constant 0 : index
    %c0_132 = arith.constant 0 : index
    %236 = vector.load %arg11[%c1_130, %c0_131, %c0_132] : memref<2x1x32xf32, #tpu.memory_space<vmem>>, vector<1x1x32xf32>
    %237 = vector.shape_cast %236 : vector<1x1x32xf32> to vector<1x32xf32>
    %c1_133 = arith.constant 1 : index
    %c0_134 = arith.constant 0 : index
    %c0_135 = arith.constant 0 : index
    %238 = vector.load %arg12[%c1_133, %c0_134, %c0_135] : memref<2x32x64xf32, #tpu.memory_space<vmem>>, vector<1x32x64xf32>
    %239 = vector.shape_cast %238 : vector<1x32x64xf32> to vector<32x64xf32>
    %c1_136 = arith.constant 1 : index
    %c0_137 = arith.constant 0 : index
    %c0_138 = arith.constant 0 : index
    %240 = vector.load %arg13[%c1_136, %c0_137, %c0_138] : memref<2x1x64xf32, #tpu.memory_space<vmem>>, vector<1x1x64xf32>
    %241 = vector.shape_cast %240 : vector<1x1x64xf32> to vector<1x64xf32>
    %c1_139 = arith.constant 1 : index
    %c0_140 = arith.constant 0 : index
    %c0_141 = arith.constant 0 : index
    %242 = vector.load %arg14[%c1_139, %c0_140, %c0_141] : memref<2x64x32xf32, #tpu.memory_space<vmem>>, vector<1x64x32xf32>
    %243 = vector.shape_cast %242 : vector<1x64x32xf32> to vector<64x32xf32>
    %c1_142 = arith.constant 1 : index
    %c0_143 = arith.constant 0 : index
    %c0_144 = arith.constant 0 : index
    %244 = vector.load %arg15[%c1_142, %c0_143, %c0_144] : memref<2x1x32xf32, #tpu.memory_space<vmem>>, vector<1x1x32xf32>
    %245 = vector.shape_cast %244 : vector<1x1x32xf32> to vector<1x32xf32>
    %c1_145 = arith.constant 1 : index
    %c0_146 = arith.constant 0 : index
    %c0_147 = arith.constant 0 : index
    %246 = vector.load %arg16[%c1_145, %c0_146, %c0_147] : memref<2x1x32xf32, #tpu.memory_space<vmem>>, vector<1x1x32xf32>
    %247 = vector.shape_cast %246 : vector<1x1x32xf32> to vector<1x32xf32>
    %c1_148 = arith.constant 1 : index
    %c0_149 = arith.constant 0 : index
    %c0_150 = arith.constant 0 : index
    %248 = vector.load %arg17[%c1_148, %c0_149, %c0_150] : memref<2x1x32xf32, #tpu.memory_space<vmem>>, vector<1x1x32xf32>
    %249 = vector.shape_cast %248 : vector<1x1x32xf32> to vector<1x32xf32>
    %250 = vector.extract_strided_slice %219 {offsets = [0, 0, 0], sizes = [1, 32, 8], strides = [1, 1, 1]} : vector<4x32x8xf32> to vector<1x32x8xf32>
    %251 = vector.shape_cast %250 : vector<1x32x8xf32> to vector<32x8xf32>
    %cst_151 = arith.constant dense<0.000000e+00> : vector<16x8xf32>
    %252 = tpu.matmul %217, %251, %cst_151 {dimension_numbers = #tpu.dot_dimension_numbers<[1], [0], [0], [1], [0, 0, 1, 1], [], []>} : vector<16x32xf32>, vector<32x8xf32>, vector<16x8xf32> -> vector<16x8xf32>
    %253 = vector.extract_strided_slice %221 {offsets = [0, 0, 0], sizes = [1, 1, 8], strides = [1, 1, 1]} : vector<4x1x8xf32> to vector<1x1x8xf32>
    %254 = vector.shape_cast %253 : vector<1x1x8xf32> to vector<1x8xf32>
    %255 = vector.broadcast %254 : vector<1x8xf32> to vector<16x8xf32>
    %256 = arith.addf %252, %255 : vector<16x8xf32>
    %257 = vector.extract_strided_slice %223 {offsets = [0, 0, 0], sizes = [1, 32, 8], strides = [1, 1, 1]} : vector<4x32x8xf32> to vector<1x32x8xf32>
    %258 = vector.shape_cast %257 : vector<1x32x8xf32> to vector<32x8xf32>
    %cst_152 = arith.constant dense<0.000000e+00> : vector<16x8xf32>
    %259 = tpu.matmul %217, %258, %cst_152 {dimension_numbers = #tpu.dot_dimension_numbers<[1], [0], [0], [1], [0, 0, 1, 1], [], []>} : vector<16x32xf32>, vector<32x8xf32>, vector<16x8xf32> -> vector<16x8xf32>
    %260 = vector.extract_strided_slice %225 {offsets = [0, 0, 0], sizes = [1, 1, 8], strides = [1, 1, 1]} : vector<4x1x8xf32> to vector<1x1x8xf32>
    %261 = vector.shape_cast %260 : vector<1x1x8xf32> to vector<1x8xf32>
    %262 = vector.broadcast %261 : vector<1x8xf32> to vector<16x8xf32>
    %263 = arith.addf %259, %262 : vector<16x8xf32>
    %264 = vector.extract_strided_slice %227 {offsets = [0, 0, 0], sizes = [1, 32, 8], strides = [1, 1, 1]} : vector<4x32x8xf32> to vector<1x32x8xf32>
    %265 = vector.shape_cast %264 : vector<1x32x8xf32> to vector<32x8xf32>
    %cst_153 = arith.constant dense<0.000000e+00> : vector<16x8xf32>
    %266 = tpu.matmul %217, %265, %cst_153 {dimension_numbers = #tpu.dot_dimension_numbers<[1], [0], [0], [1], [0, 0, 1, 1], [], []>} : vector<16x32xf32>, vector<32x8xf32>, vector<16x8xf32> -> vector<16x8xf32>
    %267 = vector.extract_strided_slice %229 {offsets = [0, 0, 0], sizes = [1, 1, 8], strides = [1, 1, 1]} : vector<4x1x8xf32> to vector<1x1x8xf32>
    %268 = vector.shape_cast %267 : vector<1x1x8xf32> to vector<1x8xf32>
    %269 = vector.broadcast %268 : vector<1x8xf32> to vector<16x8xf32>
    %270 = arith.addf %266, %269 : vector<16x8xf32>
    %cst_154 = arith.constant dense<0.000000e+00> : vector<16x16xf32>
    %271 = tpu.matmul %256, %263, %cst_154 {dimension_numbers = #tpu.dot_dimension_numbers<[1], [1], [0], [0], [0, 0, 1, 0], [], []>} : vector<16x8xf32>, vector<16x8xf32>, vector<16x16xf32> -> vector<16x16xf32>
    %272 = arith.addf %271, %1 : vector<16x16xf32>
    %273 = vector.extract_strided_slice %219 {offsets = [1, 0, 0], sizes = [1, 32, 8], strides = [1, 1, 1]} : vector<4x32x8xf32> to vector<1x32x8xf32>
    %274 = vector.shape_cast %273 : vector<1x32x8xf32> to vector<32x8xf32>
    %cst_155 = arith.constant dense<0.000000e+00> : vector<16x8xf32>
    %275 = tpu.matmul %217, %274, %cst_155 {dimension_numbers = #tpu.dot_dimension_numbers<[1], [0], [0], [1], [0, 0, 1, 1], [], []>} : vector<16x32xf32>, vector<32x8xf32>, vector<16x8xf32> -> vector<16x8xf32>
    %276 = vector.extract_strided_slice %221 {offsets = [1, 0, 0], sizes = [1, 1, 8], strides = [1, 1, 1]} : vector<4x1x8xf32> to vector<1x1x8xf32>
    %277 = vector.shape_cast %276 : vector<1x1x8xf32> to vector<1x8xf32>
    %278 = vector.broadcast %277 : vector<1x8xf32> to vector<16x8xf32>
    %279 = arith.addf %275, %278 : vector<16x8xf32>
    %280 = vector.extract_strided_slice %223 {offsets = [1, 0, 0], sizes = [1, 32, 8], strides = [1, 1, 1]} : vector<4x32x8xf32> to vector<1x32x8xf32>
    %281 = vector.shape_cast %280 : vector<1x32x8xf32> to vector<32x8xf32>
    %cst_156 = arith.constant dense<0.000000e+00> : vector<16x8xf32>
    %282 = tpu.matmul %217, %281, %cst_156 {dimension_numbers = #tpu.dot_dimension_numbers<[1], [0], [0], [1], [0, 0, 1, 1], [], []>} : vector<16x32xf32>, vector<32x8xf32>, vector<16x8xf32> -> vector<16x8xf32>
    %283 = vector.extract_strided_slice %225 {offsets = [1, 0, 0], sizes = [1, 1, 8], strides = [1, 1, 1]} : vector<4x1x8xf32> to vector<1x1x8xf32>
    %284 = vector.shape_cast %283 : vector<1x1x8xf32> to vector<1x8xf32>
    %285 = vector.broadcast %284 : vector<1x8xf32> to vector<16x8xf32>
    %286 = arith.addf %282, %285 : vector<16x8xf32>
    %287 = vector.extract_strided_slice %227 {offsets = [1, 0, 0], sizes = [1, 32, 8], strides = [1, 1, 1]} : vector<4x32x8xf32> to vector<1x32x8xf32>
    %288 = vector.shape_cast %287 : vector<1x32x8xf32> to vector<32x8xf32>
    %cst_157 = arith.constant dense<0.000000e+00> : vector<16x8xf32>
    %289 = tpu.matmul %217, %288, %cst_157 {dimension_numbers = #tpu.dot_dimension_numbers<[1], [0], [0], [1], [0, 0, 1, 1], [], []>} : vector<16x32xf32>, vector<32x8xf32>, vector<16x8xf32> -> vector<16x8xf32>
    %290 = vector.extract_strided_slice %229 {offsets = [1, 0, 0], sizes = [1, 1, 8], strides = [1, 1, 1]} : vector<4x1x8xf32> to vector<1x1x8xf32>
    %291 = vector.shape_cast %290 : vector<1x1x8xf32> to vector<1x8xf32>
    %292 = vector.broadcast %291 : vector<1x8xf32> to vector<16x8xf32>
    %293 = arith.addf %289, %292 : vector<16x8xf32>
    %cst_158 = arith.constant dense<0.000000e+00> : vector<16x16xf32>
    %294 = tpu.matmul %279, %286, %cst_158 {dimension_numbers = #tpu.dot_dimension_numbers<[1], [1], [0], [0], [0, 0, 1, 0], [], []>} : vector<16x8xf32>, vector<16x8xf32>, vector<16x16xf32> -> vector<16x16xf32>
    %295 = arith.addf %294, %1 : vector<16x16xf32>
    %296 = vector.extract_strided_slice %219 {offsets = [2, 0, 0], sizes = [1, 32, 8], strides = [1, 1, 1]} : vector<4x32x8xf32> to vector<1x32x8xf32>
    %297 = vector.shape_cast %296 : vector<1x32x8xf32> to vector<32x8xf32>
    %cst_159 = arith.constant dense<0.000000e+00> : vector<16x8xf32>
    %298 = tpu.matmul %217, %297, %cst_159 {dimension_numbers = #tpu.dot_dimension_numbers<[1], [0], [0], [1], [0, 0, 1, 1], [], []>} : vector<16x32xf32>, vector<32x8xf32>, vector<16x8xf32> -> vector<16x8xf32>
    %299 = vector.extract_strided_slice %221 {offsets = [2, 0, 0], sizes = [1, 1, 8], strides = [1, 1, 1]} : vector<4x1x8xf32> to vector<1x1x8xf32>
    %300 = vector.shape_cast %299 : vector<1x1x8xf32> to vector<1x8xf32>
    %301 = vector.broadcast %300 : vector<1x8xf32> to vector<16x8xf32>
    %302 = arith.addf %298, %301 : vector<16x8xf32>
    %303 = vector.extract_strided_slice %223 {offsets = [2, 0, 0], sizes = [1, 32, 8], strides = [1, 1, 1]} : vector<4x32x8xf32> to vector<1x32x8xf32>
    %304 = vector.shape_cast %303 : vector<1x32x8xf32> to vector<32x8xf32>
    %cst_160 = arith.constant dense<0.000000e+00> : vector<16x8xf32>
    %305 = tpu.matmul %217, %304, %cst_160 {dimension_numbers = #tpu.dot_dimension_numbers<[1], [0], [0], [1], [0, 0, 1, 1], [], []>} : vector<16x32xf32>, vector<32x8xf32>, vector<16x8xf32> -> vector<16x8xf32>
    %306 = vector.extract_strided_slice %225 {offsets = [2, 0, 0], sizes = [1, 1, 8], strides = [1, 1, 1]} : vector<4x1x8xf32> to vector<1x1x8xf32>
    %307 = vector.shape_cast %306 : vector<1x1x8xf32> to vector<1x8xf32>
    %308 = vector.broadcast %307 : vector<1x8xf32> to vector<16x8xf32>
    %309 = arith.addf %305, %308 : vector<16x8xf32>
    %310 = vector.extract_strided_slice %227 {offsets = [2, 0, 0], sizes = [1, 32, 8], strides = [1, 1, 1]} : vector<4x32x8xf32> to vector<1x32x8xf32>
    %311 = vector.shape_cast %310 : vector<1x32x8xf32> to vector<32x8xf32>
    %cst_161 = arith.constant dense<0.000000e+00> : vector<16x8xf32>
    %312 = tpu.matmul %217, %311, %cst_161 {dimension_numbers = #tpu.dot_dimension_numbers<[1], [0], [0], [1], [0, 0, 1, 1], [], []>} : vector<16x32xf32>, vector<32x8xf32>, vector<16x8xf32> -> vector<16x8xf32>
    %313 = vector.extract_strided_slice %229 {offsets = [2, 0, 0], sizes = [1, 1, 8], strides = [1, 1, 1]} : vector<4x1x8xf32> to vector<1x1x8xf32>
    %314 = vector.shape_cast %313 : vector<1x1x8xf32> to vector<1x8xf32>
    %315 = vector.broadcast %314 : vector<1x8xf32> to vector<16x8xf32>
    %316 = arith.addf %312, %315 : vector<16x8xf32>
    %cst_162 = arith.constant dense<0.000000e+00> : vector<16x16xf32>
    %317 = tpu.matmul %302, %309, %cst_162 {dimension_numbers = #tpu.dot_dimension_numbers<[1], [1], [0], [0], [0, 0, 1, 0], [], []>} : vector<16x8xf32>, vector<16x8xf32>, vector<16x16xf32> -> vector<16x16xf32>
    %318 = arith.addf %317, %1 : vector<16x16xf32>
    %319 = vector.extract_strided_slice %219 {offsets = [3, 0, 0], sizes = [1, 32, 8], strides = [1, 1, 1]} : vector<4x32x8xf32> to vector<1x32x8xf32>
    %320 = vector.shape_cast %319 : vector<1x32x8xf32> to vector<32x8xf32>
    %cst_163 = arith.constant dense<0.000000e+00> : vector<16x8xf32>
    %321 = tpu.matmul %217, %320, %cst_163 {dimension_numbers = #tpu.dot_dimension_numbers<[1], [0], [0], [1], [0, 0, 1, 1], [], []>} : vector<16x32xf32>, vector<32x8xf32>, vector<16x8xf32> -> vector<16x8xf32>
    %322 = vector.extract_strided_slice %221 {offsets = [3, 0, 0], sizes = [1, 1, 8], strides = [1, 1, 1]} : vector<4x1x8xf32> to vector<1x1x8xf32>
    %323 = vector.shape_cast %322 : vector<1x1x8xf32> to vector<1x8xf32>
    %324 = vector.broadcast %323 : vector<1x8xf32> to vector<16x8xf32>
    %325 = arith.addf %321, %324 : vector<16x8xf32>
    %326 = vector.extract_strided_slice %223 {offsets = [3, 0, 0], sizes = [1, 32, 8], strides = [1, 1, 1]} : vector<4x32x8xf32> to vector<1x32x8xf32>
    %327 = vector.shape_cast %326 : vector<1x32x8xf32> to vector<32x8xf32>
    %cst_164 = arith.constant dense<0.000000e+00> : vector<16x8xf32>
    %328 = tpu.matmul %217, %327, %cst_164 {dimension_numbers = #tpu.dot_dimension_numbers<[1], [0], [0], [1], [0, 0, 1, 1], [], []>} : vector<16x32xf32>, vector<32x8xf32>, vector<16x8xf32> -> vector<16x8xf32>
    %329 = vector.extract_strided_slice %225 {offsets = [3, 0, 0], sizes = [1, 1, 8], strides = [1, 1, 1]} : vector<4x1x8xf32> to vector<1x1x8xf32>
    %330 = vector.shape_cast %329 : vector<1x1x8xf32> to vector<1x8xf32>
    %331 = vector.broadcast %330 : vector<1x8xf32> to vector<16x8xf32>
    %332 = arith.addf %328, %331 : vector<16x8xf32>
    %333 = vector.extract_strided_slice %227 {offsets = [3, 0, 0], sizes = [1, 32, 8], strides = [1, 1, 1]} : vector<4x32x8xf32> to vector<1x32x8xf32>
    %334 = vector.shape_cast %333 : vector<1x32x8xf32> to vector<32x8xf32>
    %cst_165 = arith.constant dense<0.000000e+00> : vector<16x8xf32>
    %335 = tpu.matmul %217, %334, %cst_165 {dimension_numbers = #tpu.dot_dimension_numbers<[1], [0], [0], [1], [0, 0, 1, 1], [], []>} : vector<16x32xf32>, vector<32x8xf32>, vector<16x8xf32> -> vector<16x8xf32>
    %336 = vector.extract_strided_slice %229 {offsets = [3, 0, 0], sizes = [1, 1, 8], strides = [1, 1, 1]} : vector<4x1x8xf32> to vector<1x1x8xf32>
    %337 = vector.shape_cast %336 : vector<1x1x8xf32> to vector<1x8xf32>
    %338 = vector.broadcast %337 : vector<1x8xf32> to vector<16x8xf32>
    %339 = arith.addf %335, %338 : vector<16x8xf32>
    %cst_166 = arith.constant dense<0.000000e+00> : vector<16x16xf32>
    %340 = tpu.matmul %325, %332, %cst_166 {dimension_numbers = #tpu.dot_dimension_numbers<[1], [1], [0], [0], [0, 0, 1, 0], [], []>} : vector<16x8xf32>, vector<16x8xf32>, vector<16x16xf32> -> vector<16x16xf32>
    %341 = arith.addf %340, %1 : vector<16x16xf32>
    %342 = tpu.concatenate %272, %295, %318, %341 in 0 : vector<16x16xf32>, vector<16x16xf32>, vector<16x16xf32>, vector<16x16xf32> -> vector<64x16xf32>
    %cst_167 = arith.constant dense<0xFF800000> : vector<64xf32>
    %343 = vector.multi_reduction <maximumf>, %342, %cst_167 [1] : vector<64x16xf32> to vector<64xf32>
    %344 = vector.shape_cast %343 : vector<64xf32> to vector<64x1xf32>
    %345 = vector.broadcast %344 : vector<64x1xf32> to vector<64x16xf32>
    %346 = arith.subf %342, %345 : vector<64x16xf32>
    %347 = math.exp %346 : vector<64x16xf32>
    %cst_168 = arith.constant dense<0.000000e+00> : vector<64xf32>
    %348 = vector.multi_reduction <add>, %347, %cst_168 [1] : vector<64x16xf32> to vector<64xf32>
    %349 = vector.shape_cast %348 : vector<64xf32> to vector<64x1xf32>
    %350 = tpu.reciprocal %349 {approx = true} : vector<64x1xf32> -> vector<64x1xf32>
    %351 = vector.broadcast %350 : vector<64x1xf32> to vector<64x16xf32>
    %352 = arith.mulf %347, %351 : vector<64x16xf32>
    %cst_169 = arith.constant 0.000000e+00 : f32
    %353 = vector.broadcast %cst_169 : f32 to vector<16x32xf32>
    %354 = vector.extract_strided_slice %352 {offsets = [0, 0], sizes = [16, 16], strides = [1, 1]} : vector<64x16xf32> to vector<16x16xf32>
    %cst_170 = arith.constant dense<0.000000e+00> : vector<16x8xf32>
    %355 = tpu.matmul %354, %270, %cst_170 {dimension_numbers = #tpu.dot_dimension_numbers<[1], [0], [0], [1], [0, 0, 1, 1], [], []>} : vector<16x16xf32>, vector<16x8xf32>, vector<16x8xf32> -> vector<16x8xf32>
    %356 = vector.extract_strided_slice %231 {offsets = [0, 0, 0], sizes = [1, 8, 32], strides = [1, 1, 1]} : vector<4x8x32xf32> to vector<1x8x32xf32>
    %357 = vector.shape_cast %356 : vector<1x8x32xf32> to vector<8x32xf32>
    %cst_171 = arith.constant dense<0.000000e+00> : vector<16x32xf32>
    %358 = tpu.matmul %355, %357, %cst_171 {dimension_numbers = #tpu.dot_dimension_numbers<[1], [0], [0], [1], [0, 0, 1, 1], [], []>} : vector<16x8xf32>, vector<8x32xf32>, vector<16x32xf32> -> vector<16x32xf32>
    %359 = arith.addf %353, %358 : vector<16x32xf32>
    %360 = vector.extract_strided_slice %352 {offsets = [16, 0], sizes = [16, 16], strides = [1, 1]} : vector<64x16xf32> to vector<16x16xf32>
    %cst_172 = arith.constant dense<0.000000e+00> : vector<16x8xf32>
    %361 = tpu.matmul %360, %293, %cst_172 {dimension_numbers = #tpu.dot_dimension_numbers<[1], [0], [0], [1], [0, 0, 1, 1], [], []>} : vector<16x16xf32>, vector<16x8xf32>, vector<16x8xf32> -> vector<16x8xf32>
    %362 = vector.extract_strided_slice %231 {offsets = [1, 0, 0], sizes = [1, 8, 32], strides = [1, 1, 1]} : vector<4x8x32xf32> to vector<1x8x32xf32>
    %363 = vector.shape_cast %362 : vector<1x8x32xf32> to vector<8x32xf32>
    %cst_173 = arith.constant dense<0.000000e+00> : vector<16x32xf32>
    %364 = tpu.matmul %361, %363, %cst_173 {dimension_numbers = #tpu.dot_dimension_numbers<[1], [0], [0], [1], [0, 0, 1, 1], [], []>} : vector<16x8xf32>, vector<8x32xf32>, vector<16x32xf32> -> vector<16x32xf32>
    %365 = arith.addf %359, %364 : vector<16x32xf32>
    %366 = vector.extract_strided_slice %352 {offsets = [32, 0], sizes = [16, 16], strides = [1, 1]} : vector<64x16xf32> to vector<16x16xf32>
    %cst_174 = arith.constant dense<0.000000e+00> : vector<16x8xf32>
    %367 = tpu.matmul %366, %316, %cst_174 {dimension_numbers = #tpu.dot_dimension_numbers<[1], [0], [0], [1], [0, 0, 1, 1], [], []>} : vector<16x16xf32>, vector<16x8xf32>, vector<16x8xf32> -> vector<16x8xf32>
    %368 = vector.extract_strided_slice %231 {offsets = [2, 0, 0], sizes = [1, 8, 32], strides = [1, 1, 1]} : vector<4x8x32xf32> to vector<1x8x32xf32>
    %369 = vector.shape_cast %368 : vector<1x8x32xf32> to vector<8x32xf32>
    %cst_175 = arith.constant dense<0.000000e+00> : vector<16x32xf32>
    %370 = tpu.matmul %367, %369, %cst_175 {dimension_numbers = #tpu.dot_dimension_numbers<[1], [0], [0], [1], [0, 0, 1, 1], [], []>} : vector<16x8xf32>, vector<8x32xf32>, vector<16x32xf32> -> vector<16x32xf32>
    %371 = arith.addf %365, %370 : vector<16x32xf32>
    %372 = vector.extract_strided_slice %352 {offsets = [48, 0], sizes = [16, 16], strides = [1, 1]} : vector<64x16xf32> to vector<16x16xf32>
    %cst_176 = arith.constant dense<0.000000e+00> : vector<16x8xf32>
    %373 = tpu.matmul %372, %339, %cst_176 {dimension_numbers = #tpu.dot_dimension_numbers<[1], [0], [0], [1], [0, 0, 1, 1], [], []>} : vector<16x16xf32>, vector<16x8xf32>, vector<16x8xf32> -> vector<16x8xf32>
    %374 = vector.extract_strided_slice %231 {offsets = [3, 0, 0], sizes = [1, 8, 32], strides = [1, 1, 1]} : vector<4x8x32xf32> to vector<1x8x32xf32>
    %375 = vector.shape_cast %374 : vector<1x8x32xf32> to vector<8x32xf32>
    %cst_177 = arith.constant dense<0.000000e+00> : vector<16x32xf32>
    %376 = tpu.matmul %373, %375, %cst_177 {dimension_numbers = #tpu.dot_dimension_numbers<[1], [0], [0], [1], [0, 0, 1, 1], [], []>} : vector<16x8xf32>, vector<8x32xf32>, vector<16x32xf32> -> vector<16x32xf32>
    %377 = arith.addf %371, %376 : vector<16x32xf32>
    %378 = vector.broadcast %233 : vector<1x32xf32> to vector<16x32xf32>
    %379 = arith.addf %377, %378 : vector<16x32xf32>
    %380 = arith.addf %217, %379 : vector<16x32xf32>
    %cst_178 = arith.constant dense<0.000000e+00> : vector<16xf32>
    %381 = vector.multi_reduction <add>, %380, %cst_178 [1] : vector<16x32xf32> to vector<16xf32>
    %382 = vector.shape_cast %381 : vector<16xf32> to vector<16x1xf32>
    %cst_179 = arith.constant 3.200000e+01 : f32
    %383 = vector.broadcast %cst_179 : f32 to vector<16x1xf32>
    %384 = arith.divf %382, %383 : vector<16x1xf32>
    %385 = arith.mulf %380, %380 : vector<16x32xf32>
    %cst_180 = arith.constant dense<0.000000e+00> : vector<16xf32>
    %386 = vector.multi_reduction <add>, %385, %cst_180 [1] : vector<16x32xf32> to vector<16xf32>
    %387 = vector.shape_cast %386 : vector<16xf32> to vector<16x1xf32>
    %cst_181 = arith.constant 3.200000e+01 : f32
    %388 = vector.broadcast %cst_181 : f32 to vector<16x1xf32>
    %389 = arith.divf %387, %388 : vector<16x1xf32>
    %390 = arith.mulf %384, %384 : vector<16x1xf32>
    %391 = arith.subf %389, %390 : vector<16x1xf32>
    %392 = vector.broadcast %384 : vector<16x1xf32> to vector<16x32xf32>
    %393 = arith.subf %380, %392 : vector<16x32xf32>
    %cst_182 = arith.constant 9.99999974E-6 : f32
    %394 = vector.broadcast %cst_182 : f32 to vector<16x1xf32>
    %395 = arith.addf %391, %394 : vector<16x1xf32>
    %396 = math.rsqrt %395 : vector<16x1xf32>
    %397 = vector.broadcast %396 : vector<16x1xf32> to vector<16x32xf32>
    %398 = arith.mulf %393, %397 : vector<16x32xf32>
    %399 = vector.broadcast %235 : vector<1x32xf32> to vector<16x32xf32>
    %400 = arith.mulf %398, %399 : vector<16x32xf32>
    %401 = vector.broadcast %237 : vector<1x32xf32> to vector<16x32xf32>
    %402 = arith.addf %400, %401 : vector<16x32xf32>
    %cst_183 = arith.constant dense<0.000000e+00> : vector<16x64xf32>
    %403 = tpu.matmul %402, %239, %cst_183 {dimension_numbers = #tpu.dot_dimension_numbers<[1], [0], [0], [1], [0, 0, 1, 1], [], []>} : vector<16x32xf32>, vector<32x64xf32>, vector<16x64xf32> -> vector<16x64xf32>
    %404 = vector.broadcast %241 : vector<1x64xf32> to vector<16x64xf32>
    %405 = arith.addf %403, %404 : vector<16x64xf32>
    %cst_184 = arith.constant 0.000000e+00 : f32
    %406 = vector.broadcast %cst_184 : f32 to vector<16x64xf32>
    %407 = arith.maximumf %405, %406 : vector<16x64xf32>
    %cst_185 = arith.constant dense<0.000000e+00> : vector<16x32xf32>
    %408 = tpu.matmul %407, %243, %cst_185 {dimension_numbers = #tpu.dot_dimension_numbers<[1], [0], [0], [1], [0, 0, 1, 1], [], []>} : vector<16x64xf32>, vector<64x32xf32>, vector<16x32xf32> -> vector<16x32xf32>
    %409 = vector.broadcast %245 : vector<1x32xf32> to vector<16x32xf32>
    %410 = arith.addf %408, %409 : vector<16x32xf32>
    %411 = arith.addf %402, %410 : vector<16x32xf32>
    %cst_186 = arith.constant dense<0.000000e+00> : vector<16xf32>
    %412 = vector.multi_reduction <add>, %411, %cst_186 [1] : vector<16x32xf32> to vector<16xf32>
    %413 = vector.shape_cast %412 : vector<16xf32> to vector<16x1xf32>
    %cst_187 = arith.constant 3.200000e+01 : f32
    %414 = vector.broadcast %cst_187 : f32 to vector<16x1xf32>
    %415 = arith.divf %413, %414 : vector<16x1xf32>
    %416 = arith.mulf %411, %411 : vector<16x32xf32>
    %cst_188 = arith.constant dense<0.000000e+00> : vector<16xf32>
    %417 = vector.multi_reduction <add>, %416, %cst_188 [1] : vector<16x32xf32> to vector<16xf32>
    %418 = vector.shape_cast %417 : vector<16xf32> to vector<16x1xf32>
    %cst_189 = arith.constant 3.200000e+01 : f32
    %419 = vector.broadcast %cst_189 : f32 to vector<16x1xf32>
    %420 = arith.divf %418, %419 : vector<16x1xf32>
    %421 = arith.mulf %415, %415 : vector<16x1xf32>
    %422 = arith.subf %420, %421 : vector<16x1xf32>
    %423 = vector.broadcast %415 : vector<16x1xf32> to vector<16x32xf32>
    %424 = arith.subf %411, %423 : vector<16x32xf32>
    %cst_190 = arith.constant 9.99999974E-6 : f32
    %425 = vector.broadcast %cst_190 : f32 to vector<16x1xf32>
    %426 = arith.addf %422, %425 : vector<16x1xf32>
    %427 = math.rsqrt %426 : vector<16x1xf32>
    %428 = vector.broadcast %427 : vector<16x1xf32> to vector<16x32xf32>
    %429 = arith.mulf %424, %428 : vector<16x32xf32>
    %430 = vector.broadcast %247 : vector<1x32xf32> to vector<16x32xf32>
    %431 = arith.mulf %429, %430 : vector<16x32xf32>
    %432 = vector.broadcast %249 : vector<1x32xf32> to vector<16x32xf32>
    %433 = arith.addf %431, %432 : vector<16x32xf32>
    %c0_191 = arith.constant 0 : index
    %c0_192 = arith.constant 0 : index
    %434 = vector.load %arg18[%c0_191, %c0_192] : memref<16x32xf32, #tpu.memory_space<vmem>>, vector<16x32xf32>
    tpu.vector_store %arg18[%c0_191, %c0_192], %433 {strides = array<i32>} : memref<16x32xf32, #tpu.memory_space<vmem>>, vector<16x32xf32>,
    return
  }
}

</mosaic_0001>

<bundles_post_ra>
// kernel: tpu_custom_call.1
= control target key start
LH: loop header
LB: loop body
LE: loop exit
PB: predicated region body
PF: predicated region fallthrough
CT: control target
= control target key end

     0   :  { %s3531_s0 = inlined_call_operand.vmem [shape: f32[16,32], index: 0, kind: input, shape index: {}]   ;;  %s3532_s1 = inlined_call_operand.vmem [shape: f32[16,16], index: 1, kind: input, shape index: {}]   ;;  %s3533_s2 = inlined_call_operand.vmem [shape: f32[2,4,32,8], index: 2, kind: input, shape index: {}]   ;;  %s3534_s3 = inlined_call_operand.vmem [shape: f32[2,4,1,8], index: 3, kind: input, shape index: {}]   ;;  %s3535_s4 = inlined_call_operand.vmem [shape: f32[2,4,32,8], index: 4, kind: input, shape index: {}]   ;;  %s3536_s5 = inlined_call_operand.vmem [shape: f32[2,4,1,8], index: 5, kind: input, shape index: {}]   ;;  %s3537_s6 = inlined_call_operand.vmem [shape: f32[2,4,32,8], index: 6, kind: input, shape index: {}]   ;;  %s3538_s7 = inlined_call_operand.vmem [shape: f32[2,4,1,8], index: 7, kind: input, shape index: {}]   ;;  %s3539_s8 = inlined_call_operand.vmem [shape: f32[2,4,8,32], index: 8, kind: input, shape index: {}]   ;;  %s3540_s9 = inlined_call_operand.vmem [shape: f32[2,1,32], index: 9, kind: input, shape index: {}]   ;;  %s3541_s10 = inlined_call_operand.vmem [shape: f32[2,1,32], index: 10, kind: input, shape index: {}]   ;;  %s3542_s11 = inlined_call_operand.vmem [shape: f32[2,1,32], index: 11, kind: input, shape index: {}]   ;;  %s3543_s12 = inlined_call_operand.vmem [shape: f32[2,32,64], index: 12, kind: input, shape index: {}]   ;;  %s3544_s13 = inlined_call_operand.vmem [shape: f32[2,1,64], index: 13, kind: input, shape index: {}]   ;;  %s3545_s14 = inlined_call_operand.vmem [shape: f32[2,64,32], index: 14, kind: input, shape index: {}]   ;;  %s3546_s15 = inlined_call_operand.vmem [shape: f32[2,1,32], index: 15, kind: input, shape index: {}]   ;;  %s3547_s16 = inlined_call_operand.vmem [shape: f32[2,1,32], index: 16, kind: input, shape index: {}]   ;;  %s3548_s17 = inlined_call_operand.vmem [shape: f32[2,1,32], index: 17, kind: input, shape index: {}]   ;;  %s3549_s18 = inlined_call_operand.hbm [shape: f32[16,32], index: 18, kind: output, shape index: {}]  }
   0x1   :  { %3553 = sst [smem:[#allocation5_spill]] %s3531_s0 }
   0x2   :  { %3554 = sst [smem:[#allocation6_spill]] %s3532_s1 }
   0x3   :  { %3555 = sst [smem:[#allocation7_spill]] %s3533_s2 }
   0x4   :  { %v87_v0 = vld [vmem:[%s3535_s4 + $0x18] sm:$0xff]  ;;  %v86_v1 = vld [vmem:[%s3535_s4 + $0x10] sm:$0xff]  ;;  %s3556_s1 = sld [smem:[#allocation7_spill]]  ;;  %v85_v3 = vld [vmem:[%s3535_s4 + $0x8] sm:$0xff]  ;;  %vm150_vm0 = vcmask 261120  }
   0x5   :  { %195 = vmatpush.msra.mxu1 %v87_v0  ;;  %v84_v6 = vld [vmem:[%s3535_s4] sm:$0xff]  ;;  %s3557_s29 = sld [smem:[#allocation5_spill]]  ;;  %v91_v9 = vld [vmem:[%s3535_s4 + $0x38] sm:$0xff]  ;;  %v90_v10 = vld [vmem:[%s3535_s4 + $0x30] sm:$0xff] }
   0x6   :  { %v89_v12 = vld [vmem:[%s3535_s4 + $0x28] sm:$0xff]  ;;  %v88_v15 = vld [vmem:[%s3535_s4 + $0x20] sm:$0xff]  ;;  %v95_v18 = vld [vmem:[%s3535_s4 + $0x58] sm:$0xff] }
   0x7   :  { %196 = vmatpush.msra.mxu1 %v86_v1  ;;  %v94_v20 = vld [vmem:[%s3535_s4 + $0x50] sm:$0xff]  ;;  %v93_v21 = vld [vmem:[%s3535_s4 + $0x48] sm:$0xff]  ;;  %v92_v23 = vld [vmem:[%s3535_s4 + $0x40] sm:$0xff] }
   0x8   :  { %v99_v26 = vld [vmem:[%s3535_s4 + $0x78] sm:$0xff] }
   0x9   :  { %197 = vmatpush.msra.mxu1 %v85_v3 }
   0xa   :  { %v67_v2 = vld [vmem:[%s3556_s1 + $0x18] sm:$0xff]  ;;  %v66_v4 = vld [vmem:[%s3556_s1 + $0x10] sm:$0xff]  ;;  %v65_v5 = vld [vmem:[%s3556_s1 + $0x8] sm:$0xff] }
   0xb   :  { %169 = vmatpush.msra.mxu0 %v67_v2  ;;  %v2701_v7 = vld [vmem:[%s3557_s29] sm:$0xff]  ;;  %198 = vmatpush.msra.mxu1 %v84_v6  ;;  %v71_v11 = vld [vmem:[%s3556_s1 + $0x38] sm:$0xff]  ;;  %v70_v13 = vld [vmem:[%s3556_s1 + $0x30] sm:$0xff] }
   0xc   :  { %v64_v8 = vld [vmem:[%s3556_s1] sm:$0xff]  ;;  %2225 = vmatmul.msk.f32.vlgmr.msra.gmra.mxu1 %vm150_vm0, %v2701_v7  ;;  %v69_v14 = vld [vmem:[%s3556_s1 + $0x28] sm:$0xff]  ;;  %v75_v19 = vld [vmem:[%s3556_s1 + $0x58] sm:$0xff] }
   0xd   :  { %170 = vmatpush.msra.mxu0 %v66_v4  ;;  %309 = vmatpush.msrb.mxu1 %v91_v9  ;;  %v2734_v16 = vld [vmem:[%s3557_s29 + $0x8] sm:$0xff]  ;;  %v68_v17 = vld [vmem:[%s3556_s1 + $0x20] sm:$0xff]  ;;  %v74_v22 = vld [vmem:[%s3556_s1 + $0x50] sm:$0xff] }
   0xe   :  { %v73_v24 = vld [vmem:[%s3556_s1 + $0x48] sm:$0xff]  ;;  %v72_v25 = vld [vmem:[%s3556_s1 + $0x40] sm:$0xff] }
   0xf   :  { %171 = vmatpush.msra.mxu0 %v65_v5  ;;  %310 = vmatpush.msrb.mxu1 %v90_v10 }
  0x11   :  { %172 = vmatpush.msra.mxu0 %v64_v8  ;;  %311 = vmatpush.msrb.mxu1 %v89_v12 }
  0x12   :  { %2223 = vmatmul.msk.f32.vlgmr.msra.gmra.mxu0 %vm150_vm0, %v2701_v7 }
  0x13   :  { %283 = vmatpush.msrb.mxu0 %v71_v11  ;;  %312 = vmatpush.msrb.mxu1 %v88_v15 }
  0x14   :  { %2226 = vmatmul.msk.f32.gmra.mxu1 %vm150_vm0, %v2734_v16 }
  0x15   :  { %284 = vmatpush.msrb.mxu0 %v70_v13  ;;  %422 = vmatpush.msra.mxu1 %v95_v18 }
  0x17   :  { %285 = vmatpush.msrb.mxu0 %v69_v14  ;;  %423 = vmatpush.msra.mxu1 %v94_v20 }
  0x19   :  { %286 = vmatpush.msrb.mxu0 %v68_v17  ;;  %424 = vmatpush.msra.mxu1 %v93_v21 }
  0x1a   :  { %2224 = vmatmul.msk.f32.gmra.mxu0 %vm150_vm0, %v2734_v16 }
  0x1b   :  { %396 = vmatpush.msra.mxu0 %v75_v19 }
  0x1d   :  { %397 = vmatpush.msra.mxu0 %v74_v22 }
  0x1f   :  { %398 = vmatpush.msra.mxu0 %v73_v24 }
  0x20   :  { %23 = vsyncpa [#allocation3], 0  ;;  %425 = vmatpush.msra.mxu1 %v92_v23  ;;  %v98_v27 = vld [vmem:[%s3535_s4 + $0x70] sm:$0xff]  ;;  %v79_v28 = vld [vmem:[%s3556_s1 + $0x78] sm:$0xff]  ;;  %vm232_vm1 = vcmask 64512   ;;  %s3558_s0 = sld [smem:[#allocation6_spill]] }
  0x21   :  { %2235 = vmatmul.msk.f32.vlgmr.msrb.gmra.mxu1 %vm150_vm0, %v2701_v7  ;;  %399 = vmatpush.msra.mxu0 %v72_v25  ;;  %v97_v29 = vld [vmem:[%s3535_s4 + $0x68] sm:$0xff]  ;;  %v96_v30 = vld [vmem:[%s3535_s4 + $0x60] sm:$0xff]  ;;  %v78_v31 = vld [vmem:[%s3556_s1 + $0x70] sm:$0xff]  ;;  %vm607_vm2 = vcmask 130048   ;;  %vm1041_vm10 = vcmask 523264   ;;  %s2211_s26 = sshll.u32 %s3549_s18, 4  ;;  %s2212_s26 = int_to_ptr.hbm [resolvable:$true] %s2211_s26 }
  0x22   :  { %2233 = vmatmul.msk.f32.vlgmr.msrb.gmra.mxu0 %vm150_vm0, %v2701_v7  ;;  %535 = vmatpush.msrb.mxu1 %v99_v26  ;;  %v77_v32 = vld [vmem:[%s3556_s1 + $0x68] sm:$0xff]  ;;  %v76_v33 = vld [vmem:[%s3556_s1 + $0x60] sm:$0xff]  ;;  %v107_v26 = vld [vmem:[%s3537_s6 + $0x18] sm:$0xff] }
  0x23   :  { %509 = vmatpush.msrb.mxu0 %v79_v28  ;;  %v2430_v36 = vld [vmem:[%s3536_s5] ss:$0 sm:$0xff]  ;;  %v2432_v46 = vld [vmem:[%s3536_s5 + $0x1] ss:$0 sm:$0xff]  ;;  %v2434_v54 = vld [vmem:[%s3536_s5 + $0x2] ss:$0 sm:$0xff]  ;;  %221 = vmatpush.msra.mxu2 %v107_v26 }
  0x24   :  { %536 = vmatpush.msrb.mxu1 %v98_v27  ;;  %v2431_v40 = vld [vmem:[%s3534_s3] ss:$0 sm:$0xff]  ;;  %v2433_v49 = vld [vmem:[%s3534_s3 + $0x1] ss:$0 sm:$0xff]  ;;  %v2435_v59 = vld [vmem:[%s3534_s3 + $0x2] ss:$0 sm:$0xff] }
  0x25   :  { %510 = vmatpush.msrb.mxu0 %v78_v31  ;;  %v2436_v0 = vld [vmem:[%s3536_s5 + $0x3] ss:$0 sm:$0xff]  ;;  %v106_v27 = vld [vmem:[%s3537_s6 + $0x10] sm:$0xff]  ;;  %v105_v28 = vld [vmem:[%s3537_s6 + $0x8] sm:$0xff] }
  0x26   :  { %537 = vmatpush.msrb.mxu1 %v97_v29  ;;  %v2437_v4 = vld [vmem:[%s3534_s3 + $0x3] ss:$0 sm:$0xff]  ;;  %v2865_v15 = vld [vmem:[%s3558_s0 + $0x8] sm:$0xff]  ;;  %222 = vmatpush.msra.mxu2 %v106_v27 }
  0x27   :  { %511 = vmatpush.msrb.mxu0 %v77_v32  ;;  %v62_v11 = vld [vmem:[%s3558_s0] sm:$0xff]  ;;  %v111_v32 = vld [vmem:[%s3537_s6 + $0x38] sm:$0xff] }
  0x28   :  { %538 = vmatpush.msrb.mxu1 %v96_v30  ;;  %v104_v30 = vld [vmem:[%s3537_s6] sm:$0xff]  ;;  %223 = vmatpush.msra.mxu2 %v105_v28 }
  0x29   :  { %2236 = vmatmul.msk.f32.gmra.mxu1 %vm150_vm0, %v2734_v16  ;;  %512 = vmatpush.msrb.mxu0 %v76_v33 }
  0x2a   :  { %2234 = vmatmul.msk.f32.gmra.mxu0 %vm150_vm0, %v2734_v16  ;;  %224 = vmatpush.msra.mxu2 %v104_v30 }
  0x2b   :  { %2227 = vmatmul.msk.f32.vlgmr.msra.gmra.mxu2 %vm150_vm0, %v2701_v7 }
  0x2c   :  { %335 = vmatpush.msrb.mxu2 %v111_v32 }
  0x31   :  { %2245 = vmatmul.msk.f32.vlgmr.msra.gmra.mxu1 %vm150_vm0, %v2701_v7 }
  0x32   :  { %2243 = vmatmul.msk.f32.vlgmr.msra.gmra.mxu0 %vm150_vm0, %v2701_v7 }
  0x33   :  { %2228 = vmatmul.msk.f32.gmra.mxu2 %vm150_vm0, %v2734_v16 }
  0x39   :  { %2246 = vmatmul.msk.f32.gmra.mxu1 %vm150_vm0, %v2734_v16 }
  0x3a   :  { %2244 = vmatmul.msk.f32.gmra.mxu0 %vm150_vm0, %v2734_v16 }
  0x41   :  { %2255 = vmatmul.msk.f32.vlgmr.msrb.gmra.mxu1 %vm150_vm0, %v2701_v7 }
  0x42   :  { %2253 = vmatmul.msk.f32.vlgmr.msrb.gmra.mxu0 %vm150_vm0, %v2701_v7 }
  0x49   :  { %2256 = vmatmul.msk.f32.gmra.mxu1 %vm150_vm0, %v2734_v16 }
  0x4a   :  { %2254 = vmatmul.msk.f32.gmra.mxu0 %vm150_vm0, %v2734_v16 }
  0x89   :  { %v200_v34 = vpop.f32.mrf.mxu1 }
  0x8a   :  { %v201_v41 = vadd.f32 %v2430_v36, %v200_v34  ;;  %v110_v34 = vld [vmem:[%s3537_s6 + $0x30] sm:$0xff] }
  0x8b   :  { %336 = vmatpush.msrb.mxu2 %v110_v34 }
  0x8f   :  { %v174_v35 = vpop.f32.mrf.mxu0 }
  0x90   :  { %v175_v42 = vadd.f32 %v2431_v40, %v174_v35  ;;  %v109_v35 = vld [vmem:[%s3537_s6 + $0x28] sm:$0xff] }
  0x91   :  { %v203_v37 = vpop.f32.mrf.mxu1  ;;  %337 = vmatpush.msrb.mxu2 %v109_v35 }
  0x92   :  { %v204_v38 = vadd.f32 %v2430_v36, %v203_v37  ;;  %v108_v37 = vld [vmem:[%s3537_s6 + $0x20] sm:$0xff] }
  0x93   :  { %338 = vmatpush.msrb.mxu2 %v108_v37 }
  0x94   :  { %2229 = vmatpush.xpose.msk.msra.mxu3 %vm232_vm1, %v204_v38  ;;  %2237 = vmatmul.msk.f32.vlgmr.msrb.gmra.mxu2 %vm150_vm0, %v2701_v7 }
  0x97   :  { %v177_v39 = vpop.f32.mrf.mxu0 }
  0x98   :  { %2230 = vmatpush.xpose.msk.msra.mxu3 %vm232_vm1, %v201_v41  ;;  %v178_v45 = vadd.f32 %v2431_v40, %v177_v39 }
  0x9b   :  { %2231 = vmatmul.msk.f32.vlgmr.msra.gmra.mxu3 %vm232_vm1, %v175_v42 }
  0x9c   :  { %2238 = vmatmul.msk.f32.gmra.mxu2 %vm150_vm0, %v2734_v16 }
  0x9e   :  { %v314_v43 = vpop.f32.mrf.mxu1 }
  0x9f   :  { %v288_v44 = vpop.f32.mrf.mxu0  ;;  %v315_v50 = vadd.f32 %v2432_v46, %v314_v43 }
  0xa0   :  { %v289_v52 = vadd.f32 %v2433_v49, %v288_v44  ;;  %v115_v44 = vld [vmem:[%s3537_s6 + $0x58] sm:$0xff] }
  0xa1   :  { %448 = vmatpush.msra.mxu2 %v115_v44 }
  0xa3   :  { %2232 = vmatmul.msk.f32.gmra.mxu3 %vm232_vm1, %v178_v45  ;;  %v114_v45 = vld [vmem:[%s3537_s6 + $0x50] sm:$0xff] }
  0xa4   :  { %449 = vmatpush.msra.mxu2 %v114_v45 }
  0xa6   :  { %v317_v47 = vpop.f32.mrf.mxu1 }
  0xa7   :  { %v318_v48 = vadd.f32 %v2432_v46, %v317_v47  ;;  %v291_v51 = vpop.f32.mrf.mxu0 }
  0xa8   :  { %v292_v55 = vadd.f32 %v2433_v49, %v291_v51  ;;  %v113_v49 = vld [vmem:[%s3537_s6 + $0x48] sm:$0xff] }
  0xa9   :  { %2239 = vmatpush.xpose.msk.msrb.mxu3 %vm232_vm1, %v318_v48  ;;  %450 = vmatpush.msra.mxu2 %v113_v49 }
  0xad   :  { %2240 = vmatpush.xpose.msk.msrb.mxu3 %vm232_vm1, %v315_v50  ;;  %v112_v50 = vld [vmem:[%s3537_s6 + $0x40] sm:$0xff] }
  0xae   :  { %v427_v53 = vpop.f32.mrf.mxu1  ;;  %451 = vmatpush.msra.mxu2 %v112_v50 }
  0xaf   :  { %v401_v56 = vpop.f32.mrf.mxu0  ;;  %v428_v60 = vadd.f32 %v2434_v54, %v427_v53  ;;  %2247 = vmatmul.msk.f32.vlgmr.msra.gmra.mxu2 %vm150_vm0, %v2701_v7 }
  0xb0   :  { %2241 = vmatmul.msk.f32.vlgmr.msrb.gmra.mxu3 %vm232_vm1, %v289_v52  ;;  %v402_v61 = vadd.f32 %v2435_v59, %v401_v56 }
  0xb6   :  { %v430_v57 = vpop.f32.mrf.mxu1 }
  0xb7   :  { %v431_v58 = vadd.f32 %v2434_v54, %v430_v57  ;;  %v404_v63 = vpop.f32.mrf.mxu0  ;;  %2248 = vmatmul.msk.f32.gmra.mxu2 %vm150_vm0, %v2734_v16 }
  0xb8   :  { %2242 = vmatmul.msk.f32.gmra.mxu3 %vm232_vm1, %v292_v55  ;;  %v405_v1 = vadd.f32 %v2435_v59, %v404_v63 }
  0xb9   :  { %2249 = vmatpush.xpose.msk.msra.mxu3 %vm232_vm1, %v431_v58 }
  0xbd   :  { %2250 = vmatpush.xpose.msk.msra.mxu3 %vm232_vm1, %v428_v60 }
  0xbe   :  { %v540_v62 = vpop.f32.mrf.mxu1 }
  0xbf   :  { %v541_v5 = vadd.f32 %v2436_v0, %v540_v62  ;;  %v514_v6 = vpop.f32.mrf.mxu0 }
  0xc0   :  { %2251 = vmatmul.msk.f32.vlgmr.msra.gmra.mxu3 %vm232_vm1, %v402_v61  ;;  %v515_v8 = vadd.f32 %v2437_v4, %v514_v6  ;;  %v118_v6 = vld [vmem:[%s3537_s6 + $0x70] sm:$0xff] }
  0xc6   :  { %v543_v2 = vpop.f32.mrf.mxu1 }
  0xc7   :  { %v544_v3 = vadd.f32 %v2436_v0, %v543_v2  ;;  %v517_v9 = vpop.f32.mrf.mxu0 }
  0xc8   :  { %2252 = vmatmul.msk.f32.gmra.mxu3 %vm232_vm1, %v405_v1  ;;  %v518_v10 = vadd.f32 %v2437_v4, %v517_v9  ;;  %v119_v4 = vld [vmem:[%s3537_s6 + $0x78] sm:$0xff]  ;;  %v117_v9 = vld [vmem:[%s3537_s6 + $0x68] sm:$0xff] }
  0xc9   :  { %2259 = vmatpush.xpose.msk.msrb.mxu3 %vm232_vm1, %v544_v3  ;;  %561 = vmatpush.msrb.mxu2 %v119_v4 }
  0xcb   :  { %562 = vmatpush.msrb.mxu2 %v118_v6 }
  0xcd   :  { %2260 = vmatpush.xpose.msk.msrb.mxu3 %vm232_vm1, %v541_v5  ;;  %563 = vmatpush.msrb.mxu2 %v117_v9 }
  0xd0   :  { %2261 = vmatmul.msk.f32.vlgmr.msrb.gmra.mxu3 %vm232_vm1, %v515_v8 }
  0xd8   :  { %2262 = vmatmul.msk.f32.gmra.mxu3 %vm232_vm1, %v518_v10  ;;  %v116_v10 = vld [vmem:[%s3537_s6 + $0x60] sm:$0xff] }
  0xd9   :  { %564 = vmatpush.msrb.mxu2 %v116_v10 }
  0xda   :  { %2257 = vmatmul.msk.f32.vlgmr.msrb.gmra.mxu2 %vm150_vm0, %v2701_v7 }
  0xe2   :  { %2258 = vmatmul.msk.f32.gmra.mxu2 %vm150_vm0, %v2734_v16 }
 0x11e   :  { %v262_v12 = vpop.f32.mrf.mxu3 }
 0x11f   :  { %v2858_v13 = vadd.f32 %v262_v12, %v62_v11 }
 0x121   :  { %v608_v14 = vsel %vm607_vm2, %v2858_v13, -inf }
 0x122   :  { %609 = vmax.xlane.f32.xlu2 %v608_v14 }
 0x126   :  { %v265_v17 = vpop.f32.mrf.mxu3 }
 0x127   :  { %v266_v18 = vadd.f32 %v265_v17, %v2865_v15 }
 0x129   :  { %v611_v19 = vsel %vm607_vm2, %v266_v18, -inf }
 0x12a   :  { %612 = vmax.xlane.f32.xlu2 %v611_v19 }
 0x133   :  { %v375_v20 = vpop.f32.mrf.mxu3 }
 0x134   :  { %v376_v21 = vadd.f32 %v375_v20, %v62_v11 }
 0x136   :  { %v614_v22 = vsel %vm607_vm2, %v376_v21, -inf }
 0x137   :  { %615 = vmax.xlane.f32.xlu0 %v614_v22 }
 0x13b   :  { %v378_v23 = vpop.f32.mrf.mxu3 }
 0x13c   :  { %v379_v24 = vadd.f32 %v378_v23, %v2865_v15 }
 0x13e   :  { %v617_v25 = vsel %vm607_vm2, %v379_v24, -inf }
 0x13f   :  { %618 = vmax.xlane.f32.xlu0 %v617_v25 }
 0x143   :  { %v488_v29 = vpop.f32.mrf.mxu3 }
 0x144   :  { %v489_v31 = vadd.f32 %v488_v29, %v62_v11 }
 0x146   :  { %v620_v33 = vsel %vm607_vm2, %v489_v31, -inf }
 0x147   :  { %621 = vmax.xlane.f32.xlu2 %v620_v33  ;;  %v2439_v33 = vld [vmem:[%s3538_s7 + $0x1] ss:$0 sm:$0xff] }
 0x14b   :  { %v491_v36 = vpop.f32.mrf.mxu3 }
 0x14c   :  { %v2908_v41 = vadd.f32 %v491_v36, %v2865_v15 }
 0x14e   :  { %v623_v42 = vsel %vm607_vm2, %v2908_v41, -inf }
 0x153   :  { %v601_v38 = vpop.f32.mrf.mxu3 }
 0x154   :  { %v2901_v39 = vadd.f32 %v601_v38, %v62_v11 }
 0x156   :  { %v626_v40 = vsel %vm607_vm2, %v2901_v39, -inf }
 0x157   :  { %627 = vmax.xlane.f32.xlu0 %v626_v40 }
 0x15b   :  { %v604_v2 = vpop.f32.mrf.mxu3 }
 0x15c   :  { %v2947_v5 = vadd.f32 %v604_v2, %v2865_v15  ;;  %v226_v15 = vpop.f32.mrf.mxu2 }
 0x15e   :  { %v629_v11 = vsel %vm607_vm2, %v2947_v5, -inf }
 0x15f   :  { %624 = vmax.xlane.f32.xlu0 %v623_v42  ;;  %v2440_v42 = vld [vmem:[%s3538_s7 + $0x2] ss:$0 sm:$0xff] }
 0x164   :  { %v229_v23 = vpop.f32.mrf.mxu2 }
 0x16c   :  { %v340_v30 = vpop.f32.mrf.mxu2 }
 0x16d   :  { %v341_v35 = vadd.f32 %v2439_v33, %v340_v30 }
 0x174   :  { %v343_v34 = vpop.f32.mrf.mxu2 }
 0x175   :  { %v344_v36 = vadd.f32 %v2439_v33, %v343_v34  ;;  %v2442_v33 = vld [vmem:[%s3540_s9] ss:$0 sm:$0xff] }
 0x177   :  { %745 = vmatpush.msra.mxu1 %v344_v36 }
 0x179   :  { %746 = vmatpush.msra.mxu1 %v341_v35 }
 0x17c   :  { %v453_v38 = vpop.f32.mrf.mxu2 }
 0x17d   :  { %v454_v44 = vadd.f32 %v2440_v42, %v453_v38 }
 0x195   :  { %v610_v43 = vpop.xlane.xlu2 %609 }
 0x196   :  { %v632_v0 = vsub.f32 %v2858_v13, %v610_v43  ;;  %v456_v43 = vpop.f32.mrf.mxu2 }
 0x197   :  { %v457_v45 = vadd.f32 %v2440_v42, %v456_v43 }
 0x198   :  { %v640_v8 = vmul.f32 1.442695, %v632_v0 }
 0x19d   :  { %v613_v46 = vpop.xlane.xlu2 %612 }
 0x19e   :  { %v633_v47 = vsub.f32 %v266_v18, %v613_v46 }
 0x1a0   :  { %v642_v48 = vmul.f32 1.442695, %v633_v47 }
 0x1a2   :  { %2468 = vpow2.f32 %v642_v48 }
 0x1a8   :  { %v2928_v53 = vpop.eup %2468 }
 0x1a9   :  { %v659_v55 = vsel %vm607_vm2, %v2928_v53, 0.0 }
 0x1aa   :  { %v616_v51 = vpop.xlane.xlu0 %615  ;;  %660 = vadd.xlane.f32.xlu2 %v659_v55 }
 0x1ab   :  { %v634_v52 = vsub.f32 %v376_v21, %v616_v51  ;;  %v2438_v21 = vld [vmem:[%s3538_s7] ss:$0 sm:$0xff] }
 0x1ac   :  { %v227_v25 = vadd.f32 %v2438_v21, %v226_v15  ;;  %v230_v26 = vadd.f32 %v2438_v21, %v229_v23  ;;  %v127_v23 = vld [vmem:[%s3539_s8 + $0x18] sm:$0xff] }
 0x1ad   :  { %v644_v54 = vmul.f32 1.442695, %v634_v52  ;;  %v125_v52 = vld [vmem:[%s3539_s8 + $0x8] sm:$0xff] }
 0x1ae   :  { %716 = vmatpush.msra.mxu0 %v230_v26  ;;  %775 = vmatpush.msra.mxu2 %v125_v52 }
 0x1af   :  { %2470 = vpow2.f32 %v644_v54 }
 0x1b0   :  { %717 = vmatpush.msra.mxu0 %v227_v25 }
 0x1b2   :  { %v619_v56 = vpop.xlane.xlu0 %618  ;;  %832 = vmatpush.msrb.mxu0 %v457_v45 }
 0x1b3   :  { %v635_v57 = vsub.f32 %v379_v24, %v619_v56 }
 0x1b4   :  { %833 = vmatpush.msrb.mxu0 %v454_v44 }
 0x1b5   :  { %v2934_v58 = vpop.eup %2470  ;;  %v646_v59 = vmul.f32 1.442695, %v635_v57 }
 0x1b6   :  { %v662_v60 = vsel %vm607_vm2, %v2934_v58, 0.0 }
 0x1b7   :  { %2472 = vpow2.f32 %v646_v59  ;;  %663 = vadd.xlane.f32.xlu1 %v662_v60  ;;  %v566_v59 = vpop.f32.mrf.mxu2 }
 0x1ba   :  { %v622_v61 = vpop.xlane.xlu2 %621 }
 0x1bb   :  { %v636_v62 = vsub.f32 %v489_v31, %v622_v61 }
 0x1bd   :  { %v2938_v63 = vpop.eup %2472  ;;  %v648_v1 = vmul.f32 1.442695, %v636_v62 }
 0x1be   :  { %v665_v3 = vsel %vm607_vm2, %v2938_v63, 0.0 }
 0x1bf   :  { %2474 = vpow2.f32 %v648_v1  ;;  %666 = vadd.xlane.f32.xlu1 %v665_v3  ;;  %v569_v1 = vpop.f32.mrf.mxu2 }
 0x1c0   :  { %2476 = vpow2.f32 %v640_v8 }
 0x1c5   :  { %v2960_v12 = vpop.eup %2474 }
 0x1c6   :  { %v668_v13 = vsel %vm607_vm2, %v2960_v12, 0.0  ;;  %v2477_v17 = vpop.eup %2476 }
 0x1c7   :  { %630 = vmax.xlane.f32.xlu1 %v629_v11  ;;  %669 = vadd.xlane.f32.xlu2 %v668_v13  ;;  %v656_v20 = vsel %vm607_vm2, %v2477_v17, 0.0  ;;  %v126_v11 = vld [vmem:[%s3539_s8 + $0x10] sm:$0xff] }
 0x1c8   :  { %862 = vmatpush.msrb.mxu1 %v126_v11  ;;  %v141_v11 = vld [vmem:[%s3545_s14 + $0x28] sm:$0xff] }
 0x1ca   :  { %v628_v14 = vpop.xlane.xlu0 %627 }
 0x1cb   :  { %v638_v18 = vsub.f32 %v2901_v39, %v628_v14 }
 0x1cd   :  { %v652_v19 = vmul.f32 1.442695, %v638_v18 }
 0x1cf   :  { %2478 = vpow2.f32 %v652_v19  ;;  %657 = vadd.xlane.f32.xlu1 %v656_v20 }
 0x1d2   :  { %v625_v22 = vpop.xlane.xlu0 %624 }
 0x1d3   :  { %v637_v24 = vsub.f32 %v2908_v41, %v625_v22 }
 0x1d5   :  { %v2974_v27 = vpop.eup %2478  ;;  %v650_v28 = vmul.f32 1.442695, %v637_v24 }
 0x1d6   :  { %v674_v29 = vsel %vm607_vm2, %v2974_v27, 0.0 }
 0x1d7   :  { %2480 = vpow2.f32 %v650_v28  ;;  %675 = vadd.xlane.f32.xlu0 %v674_v29 }
 0x1dd   :  { %v2481_v31 = vpop.eup %2480 }
 0x1de   :  { %v671_v32 = vsel %vm607_vm2, %v2481_v31, 0.0 }
 0x1df   :  { %672 = vadd.xlane.f32.xlu0 %v671_v32 }
 0x21d   :  { %v661_v55 = vpop.xlane.xlu2 %660 }
 0x22a   :  { %v664_v37 = vpop.xlane.xlu1 %663 }
 0x22b   :  { %2482 = vrcp.f32 %v664_v37 }
 0x231   :  { %v2483_v39 = vpop.eup %2482 }
 0x232   :  { %v690_v40 = vmul.f32 %v2483_v39, %v2934_v58  ;;  %v667_v41 = vpop.xlane.xlu1 %666 }
 0x233   :  { %2484 = vrcp.f32 %v667_v41 }
 0x234   :  { %2265 = vmatmul.msk.f32.vlgmr.msra.gmra.mxu1 %vm607_vm2, %v690_v40 }
 0x239   :  { %v2485_v46 = vpop.eup %2484 }
 0x23a   :  { %v631_v47 = vpop.xlane.xlu1 %630  ;;  %v691_v48 = vmul.f32 %v2485_v46, %v2938_v63  ;;  %v670_v61 = vpop.xlane.xlu2 %669  ;;  %v2441_v63 = vld [vmem:[%s3538_s7 + $0x3] ss:$0 sm:$0xff] }
 0x23b   :  { %v639_v49 = vsub.f32 %v2947_v5, %v631_v47  ;;  %v567_v2 = vadd.f32 %v2441_v63, %v566_v59  ;;  %v570_v3 = vadd.f32 %v2441_v63, %v569_v1 }
 0x23c   :  { %2266 = vmatmul.msk.f32.gmra.mxu1 %vm607_vm2, %v691_v48 }
 0x23d   :  { %v654_v50 = vmul.f32 1.442695, %v639_v49  ;;  %892 = vmatpush.msrb.mxu2 %v570_v3 }
 0x23f   :  { %2486 = vpow2.f32 %v654_v50  ;;  %893 = vmatpush.msrb.mxu2 %v567_v2  ;;  %v2578_v50 = vmov 32.0  }
 0x242   :  { %v658_v51 = vpop.xlane.xlu1 %657 }
 0x243   :  { %2488 = vrcp.f32 %v658_v51 }
 0x244   :  { %2490 = vrcp.f32 %v661_v55 }
 0x245   :  { %v2487_v54 = vpop.eup %2486  ;;  %2492 = vrcp.f32 %v670_v61 }
 0x246   :  { %v677_v56 = vsel %vm607_vm2, %v2487_v54, 0.0 }
 0x247   :  { %678 = vadd.xlane.f32.xlu1 %v677_v56 }
 0x249   :  { %v2489_v57 = vpop.eup %2488 }
 0x24a   :  { %v688_v58 = vmul.f32 %v2489_v57, %v2477_v17  ;;  %v676_v60 = vpop.xlane.xlu0 %675  ;;  %v2491_v62 = vpop.eup %2490  ;;  %v133_v57 = vld [vmem:[%s3543_s12 + $0x10] sm:$0xff] }
 0x24b   :  { %v689_v0 = vmul.f32 %v2491_v62, %v2928_v53  ;;  %v2493_v5 = vpop.eup %2492  ;;  %v124_v53 = vld [vmem:[%s3539_s8] sm:$0xff] }
 0x24c   :  { %2263 = vmatmul.msk.f32.vlgmr.msra.gmra.mxu0 %vm607_vm2, %v688_v58  ;;  %v692_v6 = vmul.f32 %v2493_v5, %v2960_v12  ;;  %804 = vmatpush.msra.mxu3 %v124_v53  ;;  %v132_v58 = vld [vmem:[%s3543_s12 + $0x8] sm:$0xff] }
 0x24e   :  { %922 = vmatpush.msrb.mxu3 %v127_v23 }
 0x252   :  { %v673_v4 = vpop.xlane.xlu0 %672 }
 0x253   :  { %2494 = vrcp.f32 %v673_v4 }
 0x254   :  { %2264 = vmatmul.msk.f32.gmra.mxu0 %vm607_vm2, %v689_v0  ;;  %2496 = vrcp.f32 %v676_v60  ;;  %v131_v60 = vld [vmem:[%s3543_s12] sm:$0xff] }
 0x259   :  { %v2495_v8 = vpop.eup %2494 }
 0x25a   :  { %v693_v9 = vmul.f32 %v2495_v8, %v2481_v31  ;;  %v2497_v14 = vpop.eup %2496  ;;  %v142_v8 = vld [vmem:[%s3545_s14 + $0x30] sm:$0xff] }
 0x25b   :  { %v694_v15 = vmul.f32 %v2497_v14, %v2974_v27 }
 0x25c   :  { %2271 = vmatmul.msk.f32.vlgmr.msrb.gmra.mxu0 %vm607_vm2, %v692_v6  ;;  %v143_v6 = vld [vmem:[%s3545_s14 + $0x38] sm:$0xff] }
 0x25d   :  { %1056 = vmatpush.msra.mxu1 %v143_v6  ;;  %v2284_v6 = vld [vmem:[%s3556_s1 + $0x88] sm:$0xff] }
 0x25f   :  { %1057 = vmatpush.msra.mxu1 %v142_v8  ;;  %v2304_v8 = vld [vmem:[%s3535_s4 + $0x88] sm:$0xff] }
 0x261   :  { %1058 = vmatpush.msra.mxu1 %v141_v11  ;;  %v2323_v11 = vld [vmem:[%s3537_s6 + $0x80] sm:$0xff] }
 0x264   :  { %2272 = vmatmul.msk.f32.gmra.mxu0 %vm607_vm2, %v693_v9 }
 0x2b1   :  { %v748_v10 = vpop.f32.mrf.mxu1 }
 0x2b2   :  { %2267 = vmatmul.msk.f32.vlgmr.msra.gmra.mxu2 %vm232_vm1, %v748_v10 }
 0x2b9   :  { %v751_v12 = vpop.f32.mrf.mxu1 }
 0x2ba   :  { %2268 = vmatmul.msk.f32.gmra.mxu2 %vm232_vm1, %v751_v12  ;;  %v679_v13 = vpop.xlane.xlu1 %678 }
 0x2bb   :  { %2498 = vrcp.f32 %v679_v13  ;;  %v140_v13 = vld [vmem:[%s3545_s14 + $0x20] sm:$0xff] }
 0x2bc   :  { %2500 = vrcp.f32 %v2578_v50  ;;  %1059 = vmatpush.msra.mxu1 %v140_v13  ;;  %v2446_v50 = vld [vmem:[%s3546_s15] ss:$0 sm:$0xff] }
 0x2c1   :  { %v2499_v17 = vpop.eup %2498 }
 0x2c2   :  { %2275 = vmatmul.msk.f32.vlgmr.msrb.gmra.mxu2 %vm607_vm2, %v694_v15  ;;  %v695_v18 = vmul.f32 %v2499_v17, %v2487_v54  ;;  %v2501_v51 = vpop.eup %2500  ;;  %v139_v17 = vld [vmem:[%s3545_s14 + $0x18] sm:$0xff] }
 0x2c3   :  { %v946_v52 = vmul.f32 32.0, %v2501_v51  ;;  %vm950_vm3 = vweird.f32 %v2501_v51  ;;  %1060 = vmatpush.msra.mxu1 %v139_v17 }
 0x2c5   :  { %v947_v54 = vsub.f32 1.0, %v946_v52 }
 0x2c7   :  { %v948_v55 = vmul.f32 %v2501_v51, %v947_v54 }
 0x2c9   :  { %v719_v19 = vpop.f32.mrf.mxu0  ;;  %v949_v56 = vadd.f32 %v2501_v51, %v948_v55 }
 0x2ca   :  { %2269 = vmatmul.msk.f32.vlgmr.msra.gmra.mxu3 %vm232_vm1, %v719_v19  ;;  %2276 = vmatmul.msk.f32.gmra.mxu2 %vm607_vm2, %v695_v18 }
 0x2cb   :  { %v3051_v59 = vsel %vm950_vm3, %v2501_v51, %v949_v56 }
 0x2d1   :  { %v722_v20 = vpop.f32.mrf.mxu0 }
 0x2d2   :  { %2270 = vmatmul.msk.f32.gmra.mxu3 %vm232_vm1, %v722_v20 }
 0x2d9   :  { %v835_v21 = vpop.f32.mrf.mxu0 }
 0x2da   :  { %2273 = vmatmul.msk.f32.vlgmr.msrb.gmra.mxu1 %vm232_vm1, %v835_v21 }
 0x2e1   :  { %v838_v22 = vpop.f32.mrf.mxu0 }
 0x2e2   :  { %2274 = vmatmul.msk.f32.gmra.mxu1 %vm232_vm1, %v838_v22 }
 0x335   :  { %v777_v24 = vpop.f32.mrf.mxu2 }
 0x33d   :  { %v780_v25 = vpop.f32.mrf.mxu2 }
 0x345   :  { %v895_v26 = vpop.f32.mrf.mxu2 }
 0x346   :  { %2277 = vmatmul.msk.f32.vlgmr.msrb.gmra.mxu3 %vm232_vm1, %v895_v26  ;;  %v2443_v26 = vld [vmem:[%s3541_s10] ss:$0 sm:$0xff] }
 0x34d   :  { %v898_v27 = vpop.f32.mrf.mxu2  ;;  %v806_v28 = vpop.f32.mrf.mxu3 }
 0x34e   :  { %2278 = vmatmul.msk.f32.gmra.mxu3 %vm232_vm1, %v898_v27  ;;  %v807_v31 = vadd.f32 %v806_v28, %v777_v24 }
 0x355   :  { %v809_v29 = vpop.f32.mrf.mxu3 }
 0x356   :  { %v810_v38 = vadd.f32 %v809_v29, %v780_v25 }
 0x357   :  { %v864_v30 = vpop.f32.mrf.mxu1 }
 0x358   :  { %v870_v32 = vadd.f32 %v864_v30, %v807_v31  ;;  %v2444_v30 = vld [vmem:[%s3542_s11] ss:$0 sm:$0xff] }
 0x35f   :  { %v867_v37 = vpop.f32.mrf.mxu1 }
 0x360   :  { %v871_v40 = vadd.f32 %v867_v37, %v810_v38 }
 0x3c9   :  { %v924_v34 = vpop.f32.mrf.mxu3 }
 0x3ca   :  { %v930_v35 = vadd.f32 %v924_v34, %v870_v32 }
 0x3cc   :  { %v935_v36 = vadd.f32 %v2442_v33, %v930_v35 }
 0x3ce   :  { %v3027_v39 = vadd.f32 %v935_v36, %v2701_v7 }
 0x3d0   :  { %v939_v41 = vsel %vm150_vm0, %v3027_v39, 0.0  ;;  %v954_v42 = vmul.f32 %v3027_v39, %v3027_v39 }
 0x3d1   :  { %v927_v43 = vpop.f32.mrf.mxu3  ;;  %940 = vadd.xlane.f32.xlu1 %v939_v41  ;;  %v138_v41 = vld [vmem:[%s3545_s14 + $0x10] sm:$0xff] }
 0x3d2   :  { %v931_v44 = vadd.f32 %v927_v43, %v871_v40  ;;  %v956_v45 = vsel %vm150_vm0, %v954_v42, 0.0  ;;  %1061 = vmatpush.msra.mxu1 %v138_v41  ;;  %v137_v42 = vld [vmem:[%s3545_s14 + $0x8] sm:$0xff]  ;;  %v136_v43 = vld [vmem:[%s3545_s14] sm:$0xff] }
 0x3d3   :  { %957 = vadd.xlane.f32.xlu2 %v956_v45 }
 0x3d4   :  { %v936_v46 = vadd.f32 %v2442_v33, %v931_v44  ;;  %1062 = vmatpush.msra.mxu1 %v137_v42  ;;  %v2445_v44 = vld [vmem:[%s3544_s13] ss:$0 sm:$0xff] }
 0x3d6   :  { %v3035_v47 = vadd.f32 %v936_v46, %v2734_v16  ;;  %v134_v16 = vld [vmem:[%s3543_s12 + $0x18] sm:$0xff]  ;;  %1063 = vmatpush.msra.mxu1 %v136_v43 }
 0x3d7   :  { %1025 = vmatpush.msra.mxu0 %v134_v16 }
 0x3d8   :  { %v942_v7 = vsel %vm150_vm0, %v3035_v47, 0.0  ;;  %v955_v48 = vmul.f32 %v3035_v47, %v3035_v47 }
 0x3d9   :  { %943 = vadd.xlane.f32.xlu0 %v942_v7  ;;  %1026 = vmatpush.msra.mxu0 %v133_v57 }
 0x3da   :  { %v959_v49 = vsel %vm150_vm0, %v955_v48, 0.0 }
 0x3db   :  { %960 = vadd.xlane.f32.xlu1 %v959_v49  ;;  %1027 = vmatpush.msra.mxu0 %v132_v58 }
 0x3dd   :  { %1028 = vmatpush.msra.mxu0 %v131_v60 }
 0x444   :  { %v941_v61 = vpop.xlane.xlu1 %940 }
 0x445   :  { %v952_v62 = vmul.f32 %v3051_v59, %v941_v61 }
 0x446   :  { %v958_v63 = vpop.xlane.xlu2 %957 }
 0x447   :  { %v964_v0 = vmul.f32 %v952_v62, %v952_v62  ;;  %v962_v1 = vmul.f32 %v958_v63, %v3051_v59  ;;  %v968_v25 = vsub.f32 %v3027_v39, %v952_v62 }
 0x449   :  { %v966_v2 = vsub.f32 %v962_v1, %v964_v0  ;;  %v2286_v0 = vld [vmem:[%s3556_s1 + $0x98] sm:$0xff] }
 0x44a   :  { %v2306_v1 = vld [vmem:[%s3535_s4 + $0x98] sm:$0xff]  ;;  %1251 = vmatpush.msra.mxu2 %v2286_v0 }
 0x44b   :  { %v970_v3 = vadd.f32 1e-05, %v966_v2  ;;  %v2326_v2 = vld [vmem:[%s3537_s6 + $0x98] sm:$0xff]  ;;  %1277 = vmatpush.msra.mxu3 %v2306_v1  ;;  %v2333_v1 = vld [vmem:[%s3537_s6 + $0xd0] sm:$0xff] }
 0x44c   :  { %v944_v4 = vpop.xlane.xlu0 %943  ;;  %1303 = vmatpush.msrb.mxu0 %v2326_v2 }
 0x44d   :  { %2502 = vrsqrt.f32 %v970_v3  ;;  %v953_v5 = vmul.f32 %v3051_v59, %v944_v4  ;;  %vm978_vm5 = vweird.f32 %v970_v3  ;;  %v2305_v4 = vld [vmem:[%s3535_s4 + $0x90] sm:$0xff] }
 0x44e   :  { %v961_v9 = vpop.xlane.xlu1 %960  ;;  %1278 = vmatpush.msra.mxu3 %v2305_v4  ;;  %v2312_v4 = vld [vmem:[%s3535_s4 + $0xc8] sm:$0xff] }
 0x44f   :  { %v965_v53 = vmul.f32 %v953_v5, %v953_v5  ;;  %v963_v10 = vmul.f32 %v961_v9, %v3051_v59  ;;  %v969_v36 = vsub.f32 %v3035_v47, %v953_v5  ;;  %v2325_v5 = vld [vmem:[%s3537_s6 + $0x90] sm:$0xff]  ;;  %v2324_v9 = vld [vmem:[%s3537_s6 + $0x88] sm:$0xff] }
 0x450   :  { %1304 = vmatpush.msrb.mxu0 %v2325_v5  ;;  %1279 = vmatpush.msra.mxu3 %v2304_v8  ;;  %v2332_v5 = vld [vmem:[%s3537_s6 + $0xc8] sm:$0xff]  ;;  %v2291_v8 = vld [vmem:[%s3556_s1 + $0xc0] sm:$0xff] }
 0x451   :  { %v967_v12 = vsub.f32 %v963_v10, %v965_v53  ;;  %v2283_v53 = vld [vmem:[%s3556_s1 + $0x80] sm:$0xff] }
 0x452   :  { %1305 = vmatpush.msrb.mxu0 %v2324_v9  ;;  %v2303_v10 = vld [vmem:[%s3535_s4 + $0x80] sm:$0xff] }
 0x453   :  { %v2503_v14 = vpop.eup %2502  ;;  %v971_v15 = vadd.f32 1e-05, %v967_v12  ;;  %1280 = vmatpush.msra.mxu3 %v2303_v10  ;;  %v2331_v10 = vld [vmem:[%s3537_s6 + $0xc0] sm:$0xff] }
 0x454   :  { %v973_v18 = vmul.f32 %v2503_v14, %v970_v3  ;;  %vm979_vm4 = vweird.f32 %v2503_v14  ;;  %v2285_v3 = vld [vmem:[%s3556_s1 + $0x90] sm:$0xff]  ;;  %1306 = vmatpush.msrb.mxu0 %v2323_v11  ;;  %v2298_v11 = vld [vmem:[%s3556_s1 + $0xf8] sm:$0xff] }
 0x455   :  { %2504 = vrsqrt.f32 %v971_v15  ;;  %vm980_vm6 = vmor %vm978_vm5, %vm979_vm4  ;;  %vm988_vm8 = vweird.f32 %v971_v15  ;;  %1252 = vmatpush.msra.mxu2 %v2285_v3  ;;  %v2292_v3 = vld [vmem:[%s3556_s1 + $0xc8] sm:$0xff] }
 0x456   :  { %v974_v19 = vmul.f32 %v2503_v14, %v973_v18 }
 0x457   :  { %1253 = vmatpush.msra.mxu2 %v2284_v6 }
 0x458   :  { %v975_v20 = vmul.f32 0.5, %v974_v19 }
 0x459   :  { %1254 = vmatpush.msra.mxu2 %v2283_v53  ;;  %v2311_v53 = vld [vmem:[%s3535_s4 + $0xc0] sm:$0xff] }
 0x45a   :  { %v976_v21 = vsub.f32 1.5, %v975_v20 }
 0x45b   :  { %v2505_v22 = vpop.eup %2504 }
 0x45c   :  { %v977_v23 = vmul.f32 %v2503_v14, %v976_v21  ;;  %v983_v24 = vmul.f32 %v2505_v22, %v971_v15  ;;  %vm989_vm7 = vweird.f32 %v2505_v22 }
 0x45d   :  { %vm990_vm9 = vmor %vm988_vm8, %vm989_vm7 }
 0x45e   :  { %v981_v27 = vsel %vm980_vm6, %v2503_v14, %v977_v23  ;;  %v984_v28 = vmul.f32 %v2505_v22, %v983_v24  ;;  %v2290_v23 = vld [vmem:[%s3556_s1 + $0xb8] sm:$0xff] }
 0x45f   :  { %v992_v29 = vmul.f32 %v981_v27, %v968_v25  ;;  %v2310_v24 = vld [vmem:[%s3535_s4 + $0xb8] sm:$0xff]  ;;  %1364 = vmatpush.msrb.mxu2 %v2290_v23  ;;  %v2335_v23 = vld [vmem:[%s3537_s6 + $0xe0] sm:$0xff] }
 0x460   :  { %v985_v31 = vmul.f32 0.5, %v984_v28  ;;  %v2330_v25 = vld [vmem:[%s3537_s6 + $0xb8] sm:$0xff]  ;;  %1390 = vmatpush.msrb.mxu3 %v2310_v24  ;;  %v2289_v28 = vld [vmem:[%s3556_s1 + $0xb0] sm:$0xff] }
 0x461   :  { %v997_v32 = vmul.f32 %v2443_v26, %v992_v29  ;;  %v2309_v29 = vld [vmem:[%s3535_s4 + $0xb0] sm:$0xff]  ;;  %1365 = vmatpush.msrb.mxu2 %v2289_v28 }
 0x462   :  { %v986_v33 = vsub.f32 1.5, %v985_v31  ;;  %v2288_v31 = vld [vmem:[%s3556_s1 + $0xa8] sm:$0xff]  ;;  %1391 = vmatpush.msrb.mxu3 %v2309_v29 }
 0x463   :  { %v1002_v34 = vadd.f32 %v2444_v30, %v997_v32  ;;  %v2308_v32 = vld [vmem:[%s3535_s4 + $0xa8] sm:$0xff]  ;;  %1366 = vmatpush.msrb.mxu2 %v2288_v31  ;;  %v2451_v31 = vld [vmem:[%s3536_s5 + $0x4] ss:$0 sm:$0xff] }
 0x464   :  { %v987_v35 = vmul.f32 %v2505_v22, %v986_v33  ;;  %1392 = vmatpush.msrb.mxu3 %v2308_v32 }
 0x465   :  { %2279 = vmatmul.msk.f32.vlgmr.msra.gmra.mxu0 %vm150_vm0, %v1002_v34 }
 0x466   :  { %v991_v37 = vsel %vm990_vm9, %v2505_v22, %v987_v35  ;;  %1416 = vmatpush.msra.mxu0 %v2330_v25  ;;  %v2287_v35 = vld [vmem:[%s3556_s1 + $0xa0] sm:$0xff] }
 0x467   :  { %v993_v38 = vmul.f32 %v991_v37, %v969_v36  ;;  %v2307_v36 = vld [vmem:[%s3535_s4 + $0xa0] sm:$0xff]  ;;  %1367 = vmatpush.msrb.mxu2 %v2287_v35 }
 0x468   :  { %1393 = vmatpush.msrb.mxu3 %v2307_v36  ;;  %v2450_v36 = vld [vmem:[%s3534_s3 + $0x4] ss:$0 sm:$0xff] }
 0x469   :  { %v998_v39 = vmul.f32 %v2443_v26, %v993_v38 }
 0x46b   :  { %v1003_v40 = vadd.f32 %v2444_v30, %v998_v39  ;;  %v2329_v30 = vld [vmem:[%s3537_s6 + $0xb0] sm:$0xff]  ;;  %v2327_v39 = vld [vmem:[%s3537_s6 + $0xa0] sm:$0xff] }
 0x46c   :  { %1417 = vmatpush.msra.mxu0 %v2329_v30 }
 0x46d   :  { %2280 = vmatmul.msk.f32.gmra.mxu0 %vm150_vm0, %v1003_v40 }
 0x4e2   :  { %v1030_v45 = vpop.f32.mrf.mxu0 }
 0x4e3   :  { %v1031_v46 = vadd.f32 %v2445_v44, %v1030_v45 }
 0x4e5   :  { %v1036_v47 = vmax.f32 %v1031_v46, 0.0 }
 0x4e7   :  { %2281 = vmatmul.msk.f32.vlgmr.msra.gmra.mxu1 %vm1041_vm10, %v1036_v47 }
 0x4ea   :  { %v1033_v7 = vpop.f32.mrf.mxu0 }
 0x4eb   :  { %v1034_v48 = vadd.f32 %v2445_v44, %v1033_v7  ;;  %v2447_v7 = vld [vmem:[%s3547_s16] ss:$0 sm:$0xff] }
 0x4ed   :  { %v1037_v49 = vmax.f32 %v1034_v48, 0.0 }
 0x4ef   :  { %2282 = vmatmul.msk.f32.gmra.mxu1 %vm1041_vm10, %v1037_v49 }
 0x564   :  { %v1065_v51 = vpop.f32.mrf.mxu1 }
 0x565   :  { %v1066_v52 = vadd.f32 %v2446_v50, %v1065_v51 }
 0x567   :  { %v3102_v54 = vadd.f32 %v1066_v52, %v1002_v34  ;;  %v2328_v34 = vld [vmem:[%s3537_s6 + $0xa8] sm:$0xff] }
 0x568   :  { %1418 = vmatpush.msra.mxu0 %v2328_v34 }
 0x569   :  { %v1073_v55 = vsel %vm150_vm0, %v3102_v54, 0.0  ;;  %v1081_v16 = vmul.f32 %v3102_v54, %v3102_v54 }
 0x56a   :  { %1074 = vadd.xlane.f32.xlu2 %v1073_v55  ;;  %1419 = vmatpush.msra.mxu0 %v2327_v39 }
 0x56b   :  { %v1083_v56 = vsel %vm150_vm0, %v1081_v16, 0.0 }
 0x56c   :  { %1084 = vadd.xlane.f32.xlu0 %v1083_v56  ;;  %v1068_v57 = vpop.f32.mrf.mxu1 }
 0x56d   :  { %v1069_v58 = vadd.f32 %v2446_v50, %v1068_v57  ;;  %v2448_v50 = vld [vmem:[%s3548_s17] ss:$0 sm:$0xff] }
 0x56f   :  { %v3109_v60 = vadd.f32 %v1069_v58, %v1003_v40  ;;  %v2314_v58 = vld [vmem:[%s3535_s4 + $0xd8] sm:$0xff] }
 0x571   :  { %v1076_v61 = vsel %vm150_vm0, %v3109_v60, 0.0  ;;  %v1082_v62 = vmul.f32 %v3109_v60, %v3109_v60 }
 0x572   :  { %1077 = vadd.xlane.f32.xlu1 %v1076_v61  ;;  %v2334_v61 = vld [vmem:[%s3537_s6 + $0xd8] sm:$0xff] }
 0x573   :  { %v1086_v63 = vsel %vm150_vm0, %v1082_v62, 0.0 }
 0x574   :  { %1087 = vadd.xlane.f32.xlu2 %v1086_v63  ;;  %v2293_v63 = vld [vmem:[%s3556_s1 + $0xd0] sm:$0xff] }
 0x5dd   :  { %v1075_v12 = vpop.xlane.xlu2 %1074 }
 0x5de   :  { %v1079_v13 = vmul.f32 %v1075_v12, %v3051_v59  ;;  %v2318_v12 = vld [vmem:[%s3535_s4 + $0xf8] sm:$0xff] }
 0x5df   :  { %v1085_v14 = vpop.xlane.xlu0 %1084 }
 0x5e0   :  { %v1091_v15 = vmul.f32 %v1079_v13, %v1079_v13  ;;  %v1089_v17 = vmul.f32 %v1085_v14, %v3051_v59  ;;  %v1095_v47 = vsub.f32 %v3102_v54, %v1079_v13  ;;  %v2294_v54 = vld [vmem:[%s3556_s1 + $0xd8] sm:$0xff]  ;;  %v2297_v14 = vld [vmem:[%s3556_s1 + $0xf0] sm:$0xff] }
 0x5e1   :  { %v2338_v13 = vld [vmem:[%s3537_s6 + $0xf8] sm:$0xff] }
 0x5e2   :  { %v1093_v18 = vsub.f32 %v1089_v17, %v1091_v15  ;;  %v2317_v15 = vld [vmem:[%s3535_s4 + $0xf0] sm:$0xff] }
 0x5e3   :  { %v2337_v17 = vld [vmem:[%s3537_s6 + $0xf0] sm:$0xff] }
 0x5e4   :  { %v1097_v19 = vadd.f32 1e-05, %v1093_v18  ;;  %v2296_v18 = vld [vmem:[%s3556_s1 + $0xe8] sm:$0xff] }
 0x5e5   :  { %v1078_v20 = vpop.xlane.xlu1 %1077 }
 0x5e6   :  { %2506 = vrsqrt.f32 %v1097_v19  ;;  %v3155_v21 = vmul.f32 %v1078_v20, %v3051_v59  ;;  %vm1105_vm12 = vweird.f32 %v1097_v19  ;;  %v2336_v20 = vld [vmem:[%s3537_s6 + $0xe8] sm:$0xff] }
 0x5e7   :  { %v1088_v22 = vpop.xlane.xlu2 %1087 }
 0x5e8   :  { %v1092_v26 = vmul.f32 %v3155_v21, %v3155_v21  ;;  %v1090_v27 = vmul.f32 %v1088_v22, %v3051_v59  ;;  %v1096_v62 = vsub.f32 %v3109_v60, %v3155_v21  ;;  %v2313_v60 = vld [vmem:[%s3535_s4 + $0xd0] sm:$0xff]  ;;  %v2295_v21 = vld [vmem:[%s3556_s1 + $0xe0] sm:$0xff] }
 0x5e9   :  { %v2315_v22 = vld [vmem:[%s3535_s4 + $0xe0] sm:$0xff] }
 0x5ea   :  { %v1094_v33 = vsub.f32 %v1090_v27, %v1092_v26  ;;  %v2449_v27 = vld [vmem:[%s3538_s7 + $0x4] ss:$0 sm:$0xff] }
 0x5ec   :  { %v2507_v37 = vpop.eup %2506  ;;  %v1098_v38 = vadd.f32 1e-05, %v1094_v33 }
 0x5ed   :  { %v1100_v40 = vmul.f32 %v2507_v37, %v1097_v19  ;;  %vm1106_vm11 = vweird.f32 %v2507_v37  ;;  %v2316_v19 = vld [vmem:[%s3535_s4 + $0xe8] sm:$0xff] }
 0x5ee   :  { %2508 = vrsqrt.f32 %v1098_v38  ;;  %vm1107_vm13 = vmor %vm1105_vm12, %vm1106_vm11  ;;  %vm1115_vm15 = vweird.f32 %v1098_v38 }
 0x5ef   :  { %v1101_v41 = vmul.f32 %v2507_v37, %v1100_v40  ;;  %v2452_v40 = vld [vmem:[%s3538_s7 + $0x5] ss:$0 sm:$0xff] }
 0x5f1   :  { %v1102_v42 = vmul.f32 0.5, %v1101_v41 }
 0x5f3   :  { %v1103_v43 = vsub.f32 1.5, %v1102_v42 }
 0x5f4   :  { %v2509_v44 = vpop.eup %2508 }
 0x5f5   :  { %v1104_v45 = vmul.f32 %v2507_v37, %v1103_v43  ;;  %v1110_v46 = vmul.f32 %v2509_v44, %v1098_v38  ;;  %vm1116_vm14 = vweird.f32 %v2509_v44 }
 0x5f6   :  { %vm1117_vm3 = vmor %vm1115_vm15, %vm1116_vm14 }
 0x5f7   :  { %v1108_v48 = vsel %vm1107_vm13, %v2507_v37, %v1104_v45  ;;  %v1111_v49 = vmul.f32 %v2509_v44, %v1110_v46  ;;  %v2454_v46 = vld [vmem:[%s3536_s5 + $0x5] ss:$0 sm:$0xff] }
 0x5f8   :  { %v1119_v51 = vmul.f32 %v1108_v48, %v1095_v47 }
 0x5f9   :  { %v1112_v52 = vmul.f32 0.5, %v1111_v49 }
 0x5fa   :  { %v1124_v55 = vmul.f32 %v2447_v7, %v1119_v51 }
 0x5fb   :  { %v1113_v16 = vsub.f32 1.5, %v1112_v52 }
 0x5fc   :  { %v3203_v56 = vadd.f32 %v2448_v50, %v1124_v55 }
 0x5fd   :  { %v1114_v57 = vmul.f32 %v2509_v44, %v1113_v16 }
 0x5fe   :  { %2366 = vmatmul.msk.f32.vlgmr.msra.gmra.mxu2 %vm150_vm0, %v3203_v56  ;;  %2368 = vmatmul.msk.f32.vlgmr.msra.gmra.mxu3 %vm150_vm0, %v3203_v56 }
 0x5ff   :  { %v1118_v0 = vsel %vm1117_vm3, %v2509_v44, %v1114_v57  ;;  %2370 = vmatmul.msk.f32.vlgmr.msrb.gmra.mxu0 %vm150_vm0, %v3203_v56  ;;  %1477 = vmatpush.msra.mxu2 %v2294_v54  ;;  %v2344_v44 = vld [vmem:[%s3539_s8 + $0x28] sm:$0xff]  ;;  %v2455_v54 = vld [vmem:[%s3538_s7 + $0x6] ss:$0 sm:$0xff] }
 0x600   :  { %v1120_v2 = vmul.f32 %v1118_v0, %v1096_v62  ;;  %1503 = vmatpush.msra.mxu3 %v2314_v58  ;;  %1529 = vmatpush.msrb.mxu0 %v2334_v61 }
 0x601   :  { %1478 = vmatpush.msra.mxu2 %v2293_v63  ;;  %v2457_v63 = vld [vmem:[%s3536_s5 + $0x6] ss:$0 sm:$0xff] }
 0x602   :  { %v1125_v6 = vmul.f32 %v2447_v7, %v1120_v2  ;;  %1504 = vmatpush.msra.mxu3 %v2313_v60  ;;  %1530 = vmatpush.msrb.mxu0 %v2333_v1 }
 0x603   :  { %1479 = vmatpush.msra.mxu2 %v2292_v3  ;;  %v2456_v3 = vld [vmem:[%s3534_s3 + $0x6] ss:$0 sm:$0xff] }
 0x604   :  { %v3243_v9 = vadd.f32 %v2448_v50, %v1125_v6  ;;  %1505 = vmatpush.msra.mxu3 %v2312_v4  ;;  %1531 = vmatpush.msrb.mxu0 %v2332_v5  ;;  %v2453_v50 = vld [vmem:[%s3534_s3 + $0x5] ss:$0 sm:$0xff] }
 0x605   :  { %1480 = vmatpush.msra.mxu2 %v2291_v8 }
 0x606   :  { %2367 = vmatmul.msk.f32.gmra.mxu2 %vm150_vm0, %v3243_v9  ;;  %2369 = vmatmul.msk.f32.gmra.mxu3 %vm150_vm0, %v3243_v9 }
 0x607   :  { %2371 = vmatmul.msk.f32.gmra.mxu0 %vm150_vm0, %v3243_v9  ;;  %1506 = vmatpush.msra.mxu3 %v2311_v53  ;;  %v2458_v53 = vld [vmem:[%s3538_s7 + $0x7] ss:$0 sm:$0xff] }
 0x608   :  { %1532 = vmatpush.msrb.mxu0 %v2331_v10 }
 0x60e   :  { %2376 = vmatmul.msk.f32.vlgmr.msrb.gmra.mxu2 %vm150_vm0, %v3203_v56  ;;  %2378 = vmatmul.msk.f32.vlgmr.msrb.gmra.mxu3 %vm150_vm0, %v3203_v56 }
 0x60f   :  { %2380 = vmatmul.msk.f32.vlgmr.msra.gmra.mxu0 %vm150_vm0, %v3203_v56  ;;  %1590 = vmatpush.msrb.mxu2 %v2298_v11 }
 0x610   :  { %1616 = vmatpush.msrb.mxu3 %v2318_v12  ;;  %1642 = vmatpush.msra.mxu0 %v2338_v13  ;;  %v2460_v13 = vld [vmem:[%s3536_s5 + $0x7] ss:$0 sm:$0xff] }
 0x611   :  { %1591 = vmatpush.msrb.mxu2 %v2297_v14 }
 0x612   :  { %1617 = vmatpush.msrb.mxu3 %v2317_v15  ;;  %1643 = vmatpush.msra.mxu0 %v2337_v17 }
 0x613   :  { %1592 = vmatpush.msrb.mxu2 %v2296_v18 }
 0x614   :  { %1618 = vmatpush.msrb.mxu3 %v2316_v19  ;;  %1644 = vmatpush.msra.mxu0 %v2336_v20  ;;  %v2459_v19 = vld [vmem:[%s3534_s3 + $0x7] ss:$0 sm:$0xff] }
 0x615   :  { %1593 = vmatpush.msrb.mxu2 %v2295_v21 }
 0x616   :  { %2377 = vmatmul.msk.f32.gmra.mxu2 %vm150_vm0, %v3243_v9  ;;  %2379 = vmatmul.msk.f32.gmra.mxu3 %vm150_vm0, %v3243_v9 }
 0x617   :  { %2381 = vmatmul.msk.f32.gmra.mxu0 %vm150_vm0, %v3243_v9  ;;  %1619 = vmatpush.msrb.mxu3 %v2315_v22 }
 0x618   :  { %1645 = vmatpush.msra.mxu0 %v2335_v23 }
 0x61e   :  { %2386 = vmatmul.msk.f32.vlgmr.msra.gmra.mxu2 %vm150_vm0, %v3203_v56  ;;  %2388 = vmatmul.msk.f32.vlgmr.msra.gmra.mxu3 %vm150_vm0, %v3203_v56 }
 0x61f   :  { %2390 = vmatmul.msk.f32.vlgmr.msrb.gmra.mxu0 %vm150_vm0, %v3203_v56 }
 0x620   :  { %1855 = vmatpush.msrb.mxu0 %v2344_v44 }
 0x626   :  { %2387 = vmatmul.msk.f32.gmra.mxu2 %vm150_vm0, %v3243_v9  ;;  %2389 = vmatmul.msk.f32.gmra.mxu3 %vm150_vm0, %v3243_v9 }
 0x627   :  { %2391 = vmatmul.msk.f32.gmra.mxu0 %vm150_vm0, %v3243_v9 }
 0x62e   :  { %2396 = vmatmul.msk.f32.vlgmr.msrb.gmra.mxu2 %vm150_vm0, %v3203_v56  ;;  %2398 = vmatmul.msk.f32.vlgmr.msrb.gmra.mxu3 %vm150_vm0, %v3203_v56 }
 0x62f   :  { %2400 = vmatmul.msk.f32.vlgmr.msra.gmra.mxu0 %vm150_vm0, %v3203_v56 }
 0x636   :  { %2397 = vmatmul.msk.f32.gmra.mxu2 %vm150_vm0, %v3243_v9  ;;  %2399 = vmatmul.msk.f32.gmra.mxu3 %vm150_vm0, %v3243_v9 }
 0x637   :  { %2401 = vmatmul.msk.f32.gmra.mxu0 %vm150_vm0, %v3243_v9 }
 0x67c   :  { %v1308_v24 = vpop.f32.mrf.mxu0 }
 0x67d   :  { %v1309_v30 = vadd.f32 %v2449_v27, %v1308_v24 }
 0x681   :  { %v1256_v25 = vpop.f32.mrf.mxu2  ;;  %v1282_v26 = vpop.f32.mrf.mxu3 }
 0x682   :  { %v1283_v37 = vadd.f32 %v2451_v31, %v1282_v26  ;;  %v1257_v38 = vadd.f32 %v2450_v36, %v1256_v25 }
 0x684   :  { %v1311_v28 = vpop.f32.mrf.mxu0 }
 0x685   :  { %v1312_v29 = vadd.f32 %v2449_v27, %v1311_v28  ;;  %v2550_v27 = vld [vmem:[%s3558_s0] sm:$0xff] }
 0x687   :  { %1796 = vmatpush.msra.mxu2 %v1312_v29 }
 0x689   :  { %1797 = vmatpush.msra.mxu2 %v1309_v30  ;;  %v1285_v32 = vpop.f32.mrf.mxu3  ;;  %v1259_v33 = vpop.f32.mrf.mxu2 }
 0x68a   :  { %v1286_v34 = vadd.f32 %v2451_v31, %v1285_v32  ;;  %v1260_v47 = vadd.f32 %v2450_v36, %v1259_v33  ;;  %v2551_v31 = vld [vmem:[%s3558_s0 + $0x8] sm:$0xff] }
 0x68c   :  { %v1421_v35 = vpop.f32.mrf.mxu0  ;;  %2372 = vmatpush.xpose.msk.msrb.mxu1 %vm232_vm1, %v1286_v34 }
 0x68d   :  { %v1422_v45 = vadd.f32 %v2452_v40, %v1421_v35 }
 0x690   :  { %2373 = vmatpush.xpose.msk.msrb.mxu1 %vm232_vm1, %v1283_v37 }
 0x691   :  { %v1395_v39 = vpop.f32.mrf.mxu3  ;;  %v1369_v41 = vpop.f32.mrf.mxu2 }
 0x692   :  { %v1396_v51 = vadd.f32 %v2454_v46, %v1395_v39  ;;  %v1370_v55 = vadd.f32 %v2453_v50, %v1369_v41 }
 0x693   :  { %2374 = vmatmul.msk.f32.vlgmr.msrb.gmra.mxu1 %vm232_vm1, %v1257_v38 }
 0x694   :  { %v1424_v42 = vpop.f32.mrf.mxu0 }
 0x695   :  { %v1425_v43 = vadd.f32 %v2452_v40, %v1424_v42 }
 0x697   :  { %1825 = vmatpush.msra.mxu3 %v1425_v43 }
 0x699   :  { %1826 = vmatpush.msra.mxu3 %v1422_v45  ;;  %v1398_v7 = vpop.f32.mrf.mxu3  ;;  %v1372_v52 = vpop.f32.mrf.mxu2 }
 0x69a   :  { %v1399_v48 = vadd.f32 %v2454_v46, %v1398_v7  ;;  %v1373_v0 = vadd.f32 %v2453_v50, %v1372_v52 }
 0x69b   :  { %2375 = vmatmul.msk.f32.gmra.mxu1 %vm232_vm1, %v1260_v47 }
 0x69c   :  { %v1534_v49 = vpop.f32.mrf.mxu0  ;;  %2382 = vmatpush.xpose.msk.msra.mxu1 %vm232_vm1, %v1399_v48 }
 0x69d   :  { %v1535_v61 = vadd.f32 %v2455_v54, %v1534_v49 }
 0x6a0   :  { %2383 = vmatpush.xpose.msk.msra.mxu1 %vm232_vm1, %v1396_v51 }
 0x6a1   :  { %v1508_v16 = vpop.f32.mrf.mxu3  ;;  %v1482_v62 = vpop.f32.mrf.mxu2 }
 0x6a2   :  { %v1509_v4 = vadd.f32 %v2457_v63, %v1508_v16  ;;  %v1483_v5 = vadd.f32 %v2456_v3, %v1482_v62 }
 0x6a3   :  { %2384 = vmatmul.msk.f32.vlgmr.msra.gmra.mxu1 %vm232_vm1, %v1370_v55 }
 0x6a4   :  { %v1537_v57 = vpop.f32.mrf.mxu0 }
 0x6a5   :  { %v1538_v58 = vadd.f32 %v2455_v54, %v1537_v57 }
 0x6a7   :  { %1912 = vmatpush.msrb.mxu2 %v1538_v58 }
 0x6a9   :  { %1913 = vmatpush.msrb.mxu2 %v1535_v61  ;;  %v1511_v60 = vpop.f32.mrf.mxu3  ;;  %v1485_v8 = vpop.f32.mrf.mxu2 }
 0x6aa   :  { %v1512_v1 = vadd.f32 %v2457_v63, %v1511_v60  ;;  %v1486_v14 = vadd.f32 %v2456_v3, %v1485_v8 }
 0x6ab   :  { %2385 = vmatmul.msk.f32.gmra.mxu1 %vm232_vm1, %v1373_v0 }
 0x6ac   :  { %v1647_v2 = vpop.f32.mrf.mxu0  ;;  %2392 = vmatpush.xpose.msk.msrb.mxu1 %vm232_vm1, %v1512_v1 }
 0x6ad   :  { %v1648_v12 = vadd.f32 %v2458_v53, %v1647_v2 }
 0x6b0   :  { %2393 = vmatpush.xpose.msk.msrb.mxu1 %vm232_vm1, %v1509_v4 }
 0x6b1   :  { %v1621_v6 = vpop.f32.mrf.mxu3  ;;  %v1595_v18 = vpop.f32.mrf.mxu2 }
 0x6b2   :  { %v1622_v20 = vadd.f32 %v2460_v13, %v1621_v6  ;;  %v1596_v21 = vadd.f32 %v2459_v19, %v1595_v18 }
 0x6b3   :  { %2394 = vmatmul.msk.f32.vlgmr.msrb.gmra.mxu1 %vm232_vm1, %v1483_v5 }
 0x6b4   :  { %v1650_v10 = vpop.f32.mrf.mxu0 }
 0x6b5   :  { %v1651_v11 = vadd.f32 %v2458_v53, %v1650_v10 }
 0x6b7   :  { %1972 = vmatpush.msra.mxu0 %v1651_v11 }
 0x6b9   :  { %1973 = vmatpush.msra.mxu0 %v1648_v12  ;;  %v1624_v15 = vpop.f32.mrf.mxu3  ;;  %v1598_v22 = vpop.f32.mrf.mxu2 }
 0x6ba   :  { %v1625_v17 = vadd.f32 %v2460_v13, %v1624_v15  ;;  %v1599_v23 = vadd.f32 %v2459_v19, %v1598_v22 }
 0x6bb   :  { %2395 = vmatmul.msk.f32.gmra.mxu1 %vm232_vm1, %v1486_v14 }
 0x6bc   :  { %2402 = vmatpush.xpose.msk.msra.mxu1 %vm232_vm1, %v1625_v17 }
 0x6c0   :  { %2403 = vmatpush.xpose.msk.msra.mxu1 %vm232_vm1, %v1622_v20 }
 0x6c3   :  { %2404 = vmatmul.msk.f32.vlgmr.msra.gmra.mxu1 %vm232_vm1, %v1596_v21 }
 0x6cb   :  { %2405 = vmatmul.msk.f32.gmra.mxu1 %vm232_vm1, %v1599_v23 }
 0x710   :  { %v1343_v24 = vpop.f32.mrf.mxu1 }
 0x711   :  { %v1344_v34 = vadd.f32 %v2550_v27, %v1343_v24 }
 0x713   :  { %v1688_v36 = vsel %vm607_vm2, %v1344_v34, -inf }
 0x718   :  { %v1346_v25 = vpop.f32.mrf.mxu1 }
 0x719   :  { %v1347_v7 = vadd.f32 %v2551_v31, %v1346_v25 }
 0x71b   :  { %v1691_v16 = vsel %vm607_vm2, %v1347_v7, -inf }
 0x720   :  { %v1456_v26 = vpop.f32.mrf.mxu1 }
 0x721   :  { %v1457_v28 = vadd.f32 %v2550_v27, %v1456_v26 }
 0x723   :  { %v1694_v29 = vsel %vm607_vm2, %v1457_v28, -inf }
 0x724   :  { %1695 = vmax.xlane.f32.xlu0 %v1694_v29 }
 0x728   :  { %v1459_v30 = vpop.f32.mrf.mxu1 }
 0x729   :  { %v1460_v32 = vadd.f32 %v2551_v31, %v1459_v30 }
 0x72b   :  { %v1697_v33 = vsel %vm607_vm2, %v1460_v32, -inf }
 0x72c   :  { %1698 = vmax.xlane.f32.xlu1 %v1697_v33 }
 0x730   :  { %v1569_v35 = vpop.f32.mrf.mxu1 }
 0x731   :  { %v1570_v54 = vadd.f32 %v2550_v27, %v1569_v35 }
 0x733   :  { %v1700_v0 = vsel %vm607_vm2, %v1570_v54, -inf }
 0x734   :  { %1689 = vmax.xlane.f32.xlu1 %v1688_v36 }
 0x738   :  { %v1572_v37 = vpop.f32.mrf.mxu1 }
 0x739   :  { %v1573_v38 = vadd.f32 %v2551_v31, %v1572_v37 }
 0x73b   :  { %v1703_v39 = vsel %vm607_vm2, %v1573_v38, -inf }
 0x73c   :  { %1704 = vmax.xlane.f32.xlu1 %v1703_v39 }
 0x740   :  { %v1682_v51 = vpop.f32.mrf.mxu1 }
 0x741   :  { %v1683_v57 = vadd.f32 %v2550_v27, %v1682_v51 }
 0x743   :  { %v1706_v60 = vsel %vm607_vm2, %v1683_v57, -inf }
 0x748   :  { %v1685_v2 = vpop.f32.mrf.mxu1 }
 0x749   :  { %v1686_v3 = vadd.f32 %v2551_v31, %v1685_v2 }
 0x74b   :  { %v1709_v5 = vsel %vm607_vm2, %v1686_v3, -inf }
 0x797   :  { %v1696_v40 = vpop.xlane.xlu0 %1695 }
 0x798   :  { %v1714_v41 = vsub.f32 %v1457_v28, %v1696_v40 }
 0x79a   :  { %v1724_v42 = vmul.f32 1.442695, %v1714_v41 }
 0x79c   :  { %2510 = vpow2.f32 %v1724_v42 }
 0x79f   :  { %v1699_v43 = vpop.xlane.xlu1 %1698 }
 0x7a0   :  { %v1715_v44 = vsub.f32 %v1460_v32, %v1699_v43 }
 0x7a2   :  { %v2511_v45 = vpop.eup %2510  ;;  %v1726_v46 = vmul.f32 1.442695, %v1715_v44 }
 0x7a3   :  { %v1742_v47 = vsel %vm607_vm2, %v2511_v45, 0.0 }
 0x7a4   :  { %2512 = vpow2.f32 %v1726_v46  ;;  %1743 = vadd.xlane.f32.xlu2 %v1742_v47 }
 0x7a7   :  { %v1690_v48 = vpop.xlane.xlu1 %1689 }
 0x7a8   :  { %v1712_v49 = vsub.f32 %v1344_v34, %v1690_v48 }
 0x7aa   :  { %v2513_v50 = vpop.eup %2512  ;;  %v1720_v52 = vmul.f32 1.442695, %v1712_v49 }
 0x7ab   :  { %v1745_v55 = vsel %vm607_vm2, %v2513_v50, 0.0 }
 0x7ac   :  { %2514 = vpow2.f32 %v1720_v52  ;;  %1746 = vadd.xlane.f32.xlu0 %v1745_v55  ;;  %1692 = vmax.xlane.f32.xlu2 %v1691_v16 }
 0x7af   :  { %v1705_v58 = vpop.xlane.xlu1 %1704 }
 0x7b0   :  { %v1717_v61 = vsub.f32 %v1573_v38, %v1705_v58  ;;  %v2343_v38 = vld [vmem:[%s3539_s8 + $0x20] sm:$0xff]  ;;  %v2346_v58 = vld [vmem:[%s3539_s8 + $0x38] sm:$0xff] }
 0x7b1   :  { %1884 = vmatpush.msrb.mxu1 %v2343_v38 }
 0x7b2   :  { %v2515_v62 = vpop.eup %2514  ;;  %v1730_v63 = vmul.f32 1.442695, %v1717_v61 }
 0x7b3   :  { %v1736_v1 = vsel %vm607_vm2, %v2515_v62, 0.0  ;;  %2002 = vmatpush.msra.mxu1 %v2346_v58  ;;  %v2462_v58 = vld [vmem:[%s3541_s10 + $0x1] ss:$0 sm:$0xff] }
 0x7b4   :  { %2516 = vpow2.f32 %v1730_v63  ;;  %1701 = vmax.xlane.f32.xlu0 %v1700_v0  ;;  %1707 = vmax.xlane.f32.xlu2 %v1706_v60 }
 0x7b5   :  { %1737 = vadd.xlane.f32.xlu1 %v1736_v1 }
 0x7ba   :  { %v3400_v4 = vpop.eup %2516 }
 0x7bb   :  { %v1751_v6 = vsel %vm607_vm2, %v3400_v4, 0.0 }
 0x7bc   :  { %1710 = vmax.xlane.f32.xlu0 %v1709_v5 }
 0x7bd   :  { %1752 = vadd.xlane.f32.xlu1 %v1751_v6 }
 0x817   :  { %v1744_v8 = vpop.xlane.xlu2 %1743 }
 0x818   :  { %2518 = vrcp.f32 %v1744_v8 }
 0x81e   :  { %v2519_v53 = vpop.eup %2518 }
 0x81f   :  { %v1770_v10 = vmul.f32 %v2519_v53, %v2511_v45  ;;  %v1747_v11 = vpop.xlane.xlu0 %1746  ;;  %v1693_v12 = vpop.xlane.xlu2 %1692 }
 0x820   :  { %2520 = vrcp.f32 %v1747_v11  ;;  %v1713_v13 = vsub.f32 %v1347_v7, %v1693_v12 }
 0x821   :  { %2408 = vmatmul.msk.f32.vlgmr.msra.gmra.mxu3 %vm607_vm2, %v1770_v10  ;;  %v2461_v10 = vld [vmem:[%s3540_s9 + $0x1] ss:$0 sm:$0xff] }
 0x822   :  { %v1722_v14 = vmul.f32 1.442695, %v1713_v13 }
 0x824   :  { %2522 = vpow2.f32 %v1722_v14 }
 0x826   :  { %v2521_v15 = vpop.eup %2520 }
 0x827   :  { %v1702_v17 = vpop.xlane.xlu0 %1701  ;;  %v1708_v18 = vpop.xlane.xlu2 %1707  ;;  %v1771_v19 = vmul.f32 %v2521_v15, %v2513_v50 }
 0x828   :  { %v1716_v20 = vsub.f32 %v1570_v54, %v1702_v17  ;;  %v1718_v21 = vsub.f32 %v1683_v57, %v1708_v18  ;;  %v1738_v22 = vpop.xlane.xlu1 %1737  ;;  %v2345_v57 = vld [vmem:[%s3539_s8 + $0x30] sm:$0xff] }
 0x829   :  { %2524 = vrcp.f32 %v1738_v22  ;;  %2409 = vmatmul.msk.f32.gmra.mxu3 %vm607_vm2, %v1771_v19 }
 0x82a   :  { %v2523_v23 = vpop.eup %2522  ;;  %v1728_v24 = vmul.f32 1.442695, %v1716_v20  ;;  %v1732_v25 = vmul.f32 1.442695, %v1718_v21  ;;  %1942 = vmatpush.msrb.mxu3 %v2345_v57 }
 0x82b   :  { %v1739_v26 = vsel %vm607_vm2, %v2523_v23, 0.0 }
 0x82c   :  { %2526 = vpow2.f32 %v1728_v24  ;;  %1740 = vadd.xlane.f32.xlu2 %v1739_v26 }
 0x82d   :  { %2528 = vpow2.f32 %v1732_v25 }
 0x82f   :  { %v2525_v27 = vpop.eup %2524  ;;  %v1711_v28 = vpop.xlane.xlu0 %1710 }
 0x830   :  { %v1768_v29 = vmul.f32 %v2525_v27, %v2515_v62  ;;  %v1719_v30 = vsub.f32 %v1686_v3, %v1711_v28  ;;  %v1753_v45 = vpop.xlane.xlu1 %1752  ;;  %v2353_v27 = vld [vmem:[%s3543_s12 + $0x38] sm:$0xff]  ;;  %v2351_v28 = vld [vmem:[%s3543_s12 + $0x28] sm:$0xff] }
 0x832   :  { %v2527_v31 = vpop.eup %2526  ;;  %v1734_v32 = vmul.f32 1.442695, %v1719_v30  ;;  %2406 = vmatmul.msk.f32.vlgmr.msra.gmra.mxu2 %vm607_vm2, %v1768_v29  ;;  %v2350_v30 = vld [vmem:[%s3543_s12 + $0x20] sm:$0xff] }
 0x833   :  { %v2529_v33 = vpop.eup %2528  ;;  %v1748_v34 = vsel %vm607_vm2, %v2527_v31, 0.0  ;;  %2098 = vmatpush.msra.mxu2 %v2353_v27 }
 0x834   :  { %2530 = vpow2.f32 %v1734_v32  ;;  %1749 = vadd.xlane.f32.xlu0 %v1748_v34  ;;  %v1754_v35 = vsel %vm607_vm2, %v2529_v33, 0.0 }
 0x835   :  { %1755 = vadd.xlane.f32.xlu2 %v1754_v35 }
 0x83a   :  { %v2531_v36 = vpop.eup %2530 }
 0x83b   :  { %v1757_v37 = vsel %vm607_vm2, %v2531_v36, 0.0 }
 0x83c   :  { %1758 = vadd.xlane.f32.xlu0 %v1757_v37 }
 0x89f   :  { %v1741_v39 = vpop.xlane.xlu2 %1740 }
 0x8a0   :  { %2532 = vrcp.f32 %v1741_v39  ;;  %v2362_v39 = vld [vmem:[%s3545_s14 + $0x78] sm:$0xff] }
 0x8a1   :  { %2128 = vmatpush.msra.mxu3 %v2362_v39 }
 0x8a4   :  { %v1828_v40 = vpop.f32.mrf.mxu3 }
 0x8a5   :  { %2410 = vmatmul.msk.f32.vlgmr.msrb.gmra.mxu0 %vm232_vm1, %v1828_v40  ;;  %v2361_v40 = vld [vmem:[%s3545_s14 + $0x70] sm:$0xff] }
 0x8a6   :  { %v2533_v41 = vpop.eup %2532  ;;  %2129 = vmatpush.msra.mxu3 %v2361_v40 }
 0x8a7   :  { %v1750_v42 = vpop.xlane.xlu0 %1749  ;;  %v1769_v43 = vmul.f32 %v2533_v41, %v2523_v23 }
 0x8a8   :  { %2534 = vrcp.f32 %v1750_v42  ;;  %v1756_v44 = vpop.xlane.xlu2 %1755 }
 0x8a9   :  { %2407 = vmatmul.msk.f32.gmra.mxu2 %vm607_vm2, %v1769_v43  ;;  %2536 = vrcp.f32 %v1756_v44  ;;  %v2360_v44 = vld [vmem:[%s3545_s14 + $0x68] sm:$0xff] }
 0x8aa   :  { %2538 = vrcp.f32 %v1753_v45  ;;  %2130 = vmatpush.msra.mxu3 %v2360_v44 }
 0x8ac   :  { %v1831_v46 = vpop.f32.mrf.mxu3 }
 0x8ad   :  { %2411 = vmatmul.msk.f32.gmra.mxu0 %vm232_vm1, %v1831_v46  ;;  %v2359_v46 = vld [vmem:[%s3545_s14 + $0x60] sm:$0xff] }
 0x8ae   :  { %v2535_v47 = vpop.eup %2534  ;;  %2131 = vmatpush.msra.mxu3 %v2359_v46 }
 0x8af   :  { %v1772_v7 = vmul.f32 %v2535_v47, %v2527_v31  ;;  %v1759_v48 = vpop.xlane.xlu0 %1758  ;;  %v2537_v49 = vpop.eup %2536 }
 0x8b0   :  { %2540 = vrcp.f32 %v1759_v48  ;;  %v1774_v50 = vmul.f32 %v2537_v49, %v2529_v33  ;;  %v2539_v51 = vpop.eup %2538  ;;  %v2358_v48 = vld [vmem:[%s3545_s14 + $0x58] sm:$0xff] }
 0x8b1   :  { %2414 = vmatmul.msk.f32.vlgmr.msrb.gmra.mxu2 %vm607_vm2, %v1772_v7  ;;  %v1773_v55 = vmul.f32 %v2539_v51, %v3400_v4  ;;  %2132 = vmatpush.msra.mxu3 %v2358_v48 }
 0x8b5   :  { %v1799_v52 = vpop.f32.mrf.mxu2  ;;  %2418 = vmatmul.msk.f32.vlgmr.msra.gmra.mxu0 %vm607_vm2, %v1774_v50 }
 0x8b6   :  { %2412 = vmatmul.msk.f32.vlgmr.msrb.gmra.mxu1 %vm232_vm1, %v1799_v52  ;;  %v2541_v16 = vpop.eup %2540 }
 0x8b7   :  { %v1775_v54 = vmul.f32 %v2541_v16, %v2531_v36 }
 0x8b9   :  { %2415 = vmatmul.msk.f32.gmra.mxu2 %vm607_vm2, %v1773_v55 }
 0x8bd   :  { %2419 = vmatmul.msk.f32.gmra.mxu0 %vm607_vm2, %v1775_v54 }
 0x922   :  { %v1857_v61 = vpop.f32.mrf.mxu0 }
 0x92a   :  { %v1860_v62 = vpop.f32.mrf.mxu0 }
 0x92c   :  { %v1802_v63 = vpop.f32.mrf.mxu2 }
 0x92d   :  { %2413 = vmatmul.msk.f32.gmra.mxu1 %vm232_vm1, %v1802_v63  ;;  %v2463_v63 = vld [vmem:[%s3542_s11 + $0x1] ss:$0 sm:$0xff] }
 0x932   :  { %v1975_v0 = vpop.f32.mrf.mxu0 }
 0x933   :  { %v1886_v3 = vpop.f32.mrf.mxu1 }
 0x934   :  { %v1915_v60 = vpop.f32.mrf.mxu2  ;;  %v1887_v5 = vadd.f32 %v1886_v3, %v1857_v61 }
 0x935   :  { %2416 = vmatmul.msk.f32.vlgmr.msrb.gmra.mxu3 %vm232_vm1, %v1915_v60  ;;  %2420 = vmatmul.msk.f32.vlgmr.msra.gmra.mxu1 %vm232_vm1, %v1975_v0 }
 0x93a   :  { %v1978_v1 = vpop.f32.mrf.mxu0 }
 0x93c   :  { %v1918_v2 = vpop.f32.mrf.mxu2 }
 0x93d   :  { %2417 = vmatmul.msk.f32.gmra.mxu3 %vm232_vm1, %v1918_v2  ;;  %2421 = vmatmul.msk.f32.gmra.mxu1 %vm232_vm1, %v1978_v1 }
 0x9aa   :  { %v1889_v4 = vpop.f32.mrf.mxu1 }
 0x9ab   :  { %v1890_v13 = vadd.f32 %v1889_v4, %v1860_v62 }
 0x9b2   :  { %v2004_v6 = vpop.f32.mrf.mxu1 }
 0x9b8   :  { %v1944_v8 = vpop.f32.mrf.mxu3 }
 0x9b9   :  { %v1950_v53 = vadd.f32 %v1944_v8, %v1887_v5 }
 0x9ba   :  { %v2007_v20 = vpop.f32.mrf.mxu1 }
 0x9bb   :  { %v2010_v11 = vadd.f32 %v2004_v6, %v1950_v53 }
 0x9bd   :  { %v2015_v12 = vadd.f32 %v2461_v10, %v2010_v11  ;;  %v2357_v11 = vld [vmem:[%s3545_s14 + $0x50] sm:$0xff] }
 0x9be   :  { %2133 = vmatpush.msra.mxu3 %v2357_v11 }
 0x9bf   :  { %v3439_v14 = vadd.f32 %v2015_v12, %v3203_v56  ;;  %v2356_v12 = vld [vmem:[%s3545_s14 + $0x48] sm:$0xff] }
 0x9c0   :  { %v1947_v15 = vpop.f32.mrf.mxu3  ;;  %2134 = vmatpush.msra.mxu3 %v2356_v12 }
 0x9c1   :  { %v1951_v17 = vadd.f32 %v1947_v15, %v1890_v13  ;;  %v2019_v18 = vsel %vm150_vm0, %v3439_v14, 0.0  ;;  %v2027_v19 = vmul.f32 %v3439_v14, %v3439_v14  ;;  %v2355_v13 = vld [vmem:[%s3545_s14 + $0x40] sm:$0xff] }
 0x9c2   :  { %2020 = vadd.xlane.f32.xlu1 %v2019_v18  ;;  %2135 = vmatpush.msra.mxu3 %v2355_v13 }
 0x9c3   :  { %v2011_v21 = vadd.f32 %v2007_v20, %v1951_v17  ;;  %v2029_v22 = vsel %vm150_vm0, %v2027_v19, 0.0 }
 0x9c4   :  { %2030 = vadd.xlane.f32.xlu2 %v2029_v22  ;;  %v2465_v22 = vld [vmem:[%s3546_s15 + $0x1] ss:$0 sm:$0xff] }
 0x9c5   :  { %v2016_v23 = vadd.f32 %v2461_v10, %v2011_v21 }
 0x9c7   :  { %v3447_v24 = vadd.f32 %v2016_v23, %v3243_v9  ;;  %v2352_v9 = vld [vmem:[%s3543_s12 + $0x30] sm:$0xff]  ;;  %s2581_s12 = smov 8  }
 0x9c8   :  { %2099 = vmatpush.msra.mxu2 %v2352_v9 }
 0x9c9   :  { %v2022_v56 = vsel %vm150_vm0, %v3447_v24, 0.0  ;;  %v2028_v25 = vmul.f32 %v3447_v24, %v3447_v24 }
 0x9ca   :  { %2023 = vadd.xlane.f32.xlu0 %v2022_v56  ;;  %2100 = vmatpush.msra.mxu2 %v2351_v28 }
 0x9cb   :  { %v2032_v26 = vsel %vm150_vm0, %v2028_v25, 0.0 }
 0x9cc   :  { %2033 = vadd.xlane.f32.xlu1 %v2032_v26  ;;  %2101 = vmatpush.msra.mxu2 %v2350_v30 }
 0xa35   :  { %v2021_v29 = vpop.xlane.xlu1 %2020 }
 0xa36   :  { %v2025_v31 = vmul.f32 %v2021_v29, %v3051_v59 }
 0xa37   :  { %v2031_v32 = vpop.xlane.xlu2 %2030 }
 0xa38   :  { %v2037_v33 = vmul.f32 %v2025_v31, %v2025_v31  ;;  %v2035_v34 = vmul.f32 %v2031_v32, %v3051_v59  ;;  %v2041_v57 = vsub.f32 %v3439_v14, %v2025_v31  ;;  %v2464_v14 = vld [vmem:[%s3544_s13 + $0x1] ss:$0 sm:$0xff] }
 0xa3a   :  { %v2039_v35 = vsub.f32 %v2035_v34, %v2037_v33 }
 0xa3c   :  { %v2043_v36 = vadd.f32 1e-05, %v2039_v35 }
 0xa3d   :  { %v2024_v37 = vpop.xlane.xlu0 %2023 }
 0xa3e   :  { %2542 = vrsqrt.f32 %v2043_v36  ;;  %v2026_v38 = vmul.f32 %v2024_v37, %v3051_v59  ;;  %vm2051_vm2 = vweird.f32 %v2043_v36 }
 0xa3f   :  { %v2034_v41 = vpop.xlane.xlu1 %2033 }
 0xa40   :  { %v2038_v42 = vmul.f32 %v2026_v38, %v2026_v38  ;;  %v2036_v43 = vmul.f32 %v2034_v41, %v3051_v59  ;;  %v2042_v5 = vsub.f32 %v3447_v24, %v2026_v38 }
 0xa42   :  { %v2040_v45 = vsub.f32 %v2036_v43, %v2038_v42 }
 0xa44   :  { %v2543_v47 = vpop.eup %2542  ;;  %v2044_v7 = vadd.f32 1e-05, %v2040_v45 }
 0xa45   :  { %v2046_v49 = vmul.f32 %v2543_v47, %v2043_v36  ;;  %vm2052_vm1 = vweird.f32 %v2543_v47 }
 0xa46   :  { %2544 = vrsqrt.f32 %v2044_v7  ;;  %vm2053_vm4 = vmor %vm2051_vm2, %vm2052_vm1  ;;  %vm2061_vm6 = vweird.f32 %v2044_v7 }
 0xa47   :  { %v2047_v50 = vmul.f32 %v2543_v47, %v2046_v49 }
 0xa49   :  { %v2048_v51 = vmul.f32 0.5, %v2047_v50 }
 0xa4b   :  { %v2049_v52 = vsub.f32 1.5, %v2048_v51 }
 0xa4c   :  { %v2545_v55 = vpop.eup %2544 }
 0xa4d   :  { %v2050_v16 = vmul.f32 %v2543_v47, %v2049_v52  ;;  %v2056_v54 = vmul.f32 %v2545_v55, %v2044_v7  ;;  %vm2062_vm5 = vweird.f32 %v2545_v55 }
 0xa4e   :  { %vm2063_vm7 = vmor %vm2061_vm6, %vm2062_vm5 }
 0xa4f   :  { %v2054_v61 = vsel %vm2053_vm4, %v2543_v47, %v2050_v16  ;;  %v2057_v62 = vmul.f32 %v2545_v55, %v2056_v54  ;;  %v2466_v54 = vld [vmem:[%s3547_s16 + $0x1] ss:$0 sm:$0xff]  ;;  %s2579_s16 = smov [#allocation2]  }
 0xa50   :  { %v2065_v0 = vmul.f32 %v2054_v61, %v2041_v57  ;;  %v2467_v61 = vld [vmem:[%s3548_s17 + $0x1] ss:$0 sm:$0xff]  ;;  %s2209_s7 = sshll.u32 %s2579_s16, 4  ;;  %s2580_s17 = smov 128   ;;  %s2210_s7 = int_to_ptr.vmem [resolvable:$true] %s2209_s7 }
 0xa51   :  { %v2058_v60 = vmul.f32 0.5, %v2057_v62 }
 0xa52   :  { %v2070_v1 = vmul.f32 %v2462_v58, %v2065_v0 }
 0xa53   :  { %v2059_v2 = vsub.f32 1.5, %v2058_v60 }
 0xa54   :  { %v2075_v3 = vadd.f32 %v2463_v63, %v2070_v1 }
 0xa55   :  { %v2060_v4 = vmul.f32 %v2545_v55, %v2059_v2 }
 0xa56   :  { %2422 = vmatmul.msk.f32.vlgmr.msra.gmra.mxu2 %vm150_vm0, %v2075_v3 }
 0xa57   :  { %v2064_v6 = vsel %vm2063_vm7, %v2545_v55, %v2060_v4 }
 0xa58   :  { %v2066_v8 = vmul.f32 %v2064_v6, %v2042_v5 }
 0xa5a   :  { %v2071_v53 = vmul.f32 %v2462_v58, %v2066_v8 }
 0xa5c   :  { %v2076_v10 = vadd.f32 %v2463_v63, %v2071_v53 }
 0xa5e   :  { %2423 = vmatmul.msk.f32.gmra.mxu2 %vm150_vm0, %v2076_v10 }
 0xad9   :  { %v2103_v15 = vpop.f32.mrf.mxu2 }
 0xada   :  { %v2104_v17 = vadd.f32 %v2464_v14, %v2103_v15 }
 0xadc   :  { %v2109_v18 = vmax.f32 %v2104_v17, 0.0 }
 0xade   :  { %2424 = vmatmul.msk.f32.vlgmr.msra.gmra.mxu3 %vm1041_vm10, %v2109_v18 }
 0xae1   :  { %v2106_v19 = vpop.f32.mrf.mxu2 }
 0xae2   :  { %v2107_v20 = vadd.f32 %v2464_v14, %v2106_v19 }
 0xae4   :  { %v2110_v21 = vmax.f32 %v2107_v20, 0.0 }
 0xae6   :  { %2425 = vmatmul.msk.f32.gmra.mxu3 %vm1041_vm10, %v2110_v21 }
 0xb61   :  { %v2137_v23 = vpop.f32.mrf.mxu3 }
 0xb62   :  { %v2138_v24 = vadd.f32 %v2465_v22, %v2137_v23 }
 0xb64   :  { %v2143_v56 = vadd.f32 %v2138_v24, %v2075_v3 }
 0xb66   :  { %v2145_v25 = vsel %vm150_vm0, %v2143_v56, 0.0  ;;  %v2153_v26 = vmul.f32 %v2143_v56, %v2143_v56 }
 0xb67   :  { %2146 = vadd.xlane.f32.xlu2 %v2145_v25 }
 0xb68   :  { %v2155_v27 = vsel %vm150_vm0, %v2153_v26, 0.0 }
 0xb69   :  { %2156 = vadd.xlane.f32.xlu1 %v2155_v27  ;;  %v2140_v9 = vpop.f32.mrf.mxu3 }
 0xb6a   :  { %v2141_v28 = vadd.f32 %v2465_v22, %v2140_v9 }
 0xb6c   :  { %v2144_v29 = vadd.f32 %v2141_v28, %v2076_v10 }
 0xb6e   :  { %v2148_v30 = vsel %vm150_vm0, %v2144_v29, 0.0  ;;  %v2154_v31 = vmul.f32 %v2144_v29, %v2144_v29 }
 0xb6f   :  { %2149 = vadd.xlane.f32.xlu0 %v2148_v30 }
 0xb70   :  { %v2158_v32 = vsel %vm150_vm0, %v2154_v31, 0.0 }
 0xb71   :  { %2159 = vadd.xlane.f32.xlu2 %v2158_v32 }
 0xbda   :  { %v2147_v33 = vpop.xlane.xlu2 %2146 }
 0xbdb   :  { %v2151_v34 = vmul.f32 %v2147_v33, %v3051_v59 }
 0xbdc   :  { %v2157_v35 = vpop.xlane.xlu1 %2156 }
 0xbdd   :  { %v2163_v36 = vmul.f32 %v2151_v34, %v2151_v34  ;;  %v2161_v37 = vmul.f32 %v2157_v35, %v3051_v59  ;;  %v2167_v16 = vsub.f32 %v2143_v56, %v2151_v34 }
 0xbdf   :  { %v2165_v38 = vsub.f32 %v2161_v37, %v2163_v36 }
 0xbe1   :  { %v2169_v39 = vadd.f32 1e-05, %v2165_v38 }
 0xbe2   :  { %v2150_v40 = vpop.xlane.xlu0 %2149 }
 0xbe3   :  { %2546 = vrsqrt.f32 %v2169_v39  ;;  %v2152_v41 = vmul.f32 %v2150_v40, %v3051_v59  ;;  %vm2177_vm9 = vweird.f32 %v2169_v39 }
 0xbe4   :  { %v2160_v42 = vpop.xlane.xlu2 %2159 }
 0xbe5   :  { %v2164_v43 = vmul.f32 %v2152_v41, %v2152_v41  ;;  %v2162_v44 = vmul.f32 %v2160_v42, %v3051_v59  ;;  %v2168_v2 = vsub.f32 %v2144_v29, %v2152_v41 }
 0xbe7   :  { %v2166_v45 = vsub.f32 %v2162_v44, %v2164_v43 }
 0xbe9   :  { %v2547_v46 = vpop.eup %2546  ;;  %v2170_v47 = vadd.f32 1e-05, %v2166_v45 }
 0xbea   :  { %v2172_v7 = vmul.f32 %v2547_v46, %v2169_v39  ;;  %vm2178_vm8 = vweird.f32 %v2547_v46 }
 0xbeb   :  { %2548 = vrsqrt.f32 %v2170_v47  ;;  %vm2179_vm10 = vmor %vm2177_vm9, %vm2178_vm8  ;;  %vm2187_vm12 = vweird.f32 %v2170_v47 }
 0xbec   :  { %v2173_v48 = vmul.f32 %v2547_v46, %v2172_v7 }
 0xbee   :  { %v2174_v49 = vmul.f32 0.5, %v2173_v48 }
 0xbf0   :  { %v2175_v50 = vsub.f32 1.5, %v2174_v49 }
 0xbf1   :  { %v2549_v51 = vpop.eup %2548 }
 0xbf2   :  { %v2176_v52 = vmul.f32 %v2547_v46, %v2175_v50  ;;  %v2182_v55 = vmul.f32 %v2549_v51, %v2170_v47  ;;  %vm2188_vm11 = vweird.f32 %v2549_v51 }
 0xbf3   :  { %vm2189_vm13 = vmor %vm2187_vm12, %vm2188_vm11 }
 0xbf4   :  { %v2180_v59 = vsel %vm2179_vm10, %v2547_v46, %v2176_v52  ;;  %v2183_v57 = vmul.f32 %v2549_v51, %v2182_v55 }
 0xbf5   :  { %v2191_v58 = vmul.f32 %v2180_v59, %v2167_v16 }
 0xbf6   :  { %v2184_v62 = vmul.f32 0.5, %v2183_v57 }
 0xbf7   :  { %v2196_v63 = vmul.f32 %v2466_v54, %v2191_v58 }
 0xbf8   :  { %v2185_v0 = vsub.f32 1.5, %v2184_v62 }
 0xbf9   :  { %v2201_v60 = vadd.f32 %v2467_v61, %v2196_v63 }
 0xbfa   :  { %v2186_v1 = vmul.f32 %v2549_v51, %v2185_v0 }
 0xbfb   :  { %2203 = vst.msk [vmem:[#allocation2] sm:$0xff] %vm150_vm0, %v2201_v60 }
 0xbfc   :  { %v2190_v3 = vsel %vm2189_vm13, %v2549_v51, %v2186_v1 }
 0xbfd   :  { %v2192_v4 = vmul.f32 %v2190_v3, %v2168_v2 }
 0xbff   :  { %v2197_v5 = vmul.f32 %v2466_v54, %v2192_v4 }
 0xc01   :  { %v2202_v6 = vadd.f32 %v2467_v61, %v2197_v5 }
 0xc03   :  { %2204 = vst.msk [vmem:[#allocation2 + $0x8] sm:$0xff] %vm150_vm0, %v2202_v6 }
 0xc04   :  { %2217 = dma.vmem_to_hbm [thread:$0]  %s2210_s7, 256, %s2212_s26, [#allocation3], %s2580_s17, %s2580_s17, %s2581_s12  }
 0xc05   :  { %2576 = dma.done.wait [#allocation3], 256  }
 0xc06   :  { %2577 = vsyncadd [#allocation3], 4294967040 }
 0xc07   :  { %2222 = vsyncpa [#allocation3], 1 }

</bundles_post_ra>
